<compile_context>
chip_gen: v7x
topology: tpu7x:2x2x1
jax: 0.10.0
libtpu: 0.0.40
codegen_flags: <defaults>
</compile_context>

<pallas_src>
import functools

import jax
import jax.numpy as jnp
from jax.experimental import pallas as pl
from jax.experimental.pallas import tpu as pltpu


# ----------------------------- static geometry ------------------------------

H_IN = 14                  # per-branch input image is (B, 14, 14)
OH1 = 12                   # conv1 output H/W
PW1 = 6                    # conv1 pooled H/W
C1 = 32                    # conv1 channels
OH2 = 4                    # conv2 output H/W
C2 = 64                    # conv2 channels
N_FC1 = 200
N_FC2 = 10

K1 = 3 * H_IN              # 42  : conv1 tap-merged contraction depth
N1 = OH1 * C1              # 384 : conv1 packed output columns
HALF1 = PW1 * C1           # 192 : one W-pool half of conv1 / conv2 K depth
N2 = OH2 * C2              # 256 : conv2 packed output columns
HALF2 = 2 * C2             # 128 : one W-pool half of conv2
FC1P = 256                 # fc1 output padded 200 -> 256 lanes
OUTP = 128                 # fc2 output padded 10 -> 128 lanes

# conv1 output rows grouped so H-pool partners are whole-slab maxes:
# group 0 = rows {0,4,8}, 1 = {1,5,9}, 2 = {2,6,10}, 3 = {3,7,11}.
_GROUP_ROWS = (0, 4, 8, 1, 5, 9, 2, 6, 10, 3, 7, 11)

DEFAULT_TB = 128           # batch tile (fits default scoped VMEM on v5e/v6e/v7x)


# ------------------------------ Pallas kernel -------------------------------

def _branch_kernel(x_ref, w1_ref, b1_ref, w2_ref, b2_ref,
                   wf1_ref, bf1_ref, wf2_ref, bf2_ref,
                   o_ref, p1e_ref, p1o_ref, *, tb):
    """One (branch, batch-tile) grid step, all activations resident in VMEM."""
    f32 = jnp.float32

    # ---- conv1: tap-merged K=42 matmul per output-row group ----------------
    # x_ref[g] is (3*TB, 42): rows = [oh=g | oh=g+4 | oh=g+8] x batch tile,
    # columns = concat of the 3 input rows (kh*14 + iw).  The RHS packs output
    # columns as [even ow | odd ow] (each half = 6*32 = 192).
    y = [jnp.dot(x_ref[g], w1_ref[...], preferred_element_type=f32)
         for g in range(4)]                                    # each (3*TB, 384)

    # H-pool = elementwise max of partner row groups; W-pool = half max;
    # pre-tiled bias added once per slab; ReLU.  Two full-slab aligned stores.
    yE = jnp.maximum(y[0], y[1])          # pooled rows {0, 2, 4}
    yO = jnp.maximum(y[2], y[3])          # pooled rows {1, 3, 5}
    b1 = b1_ref[...]                      # (1, 192) pre-tiled bias
    p1e_ref[...] = jnp.maximum(
        jnp.maximum(yE[:, :HALF1], yE[:, HALF1:]) + b1, 0.0)   # (3*TB, 192)
    p1o_ref[...] = jnp.maximum(
        jnp.maximum(yO[:, :HALF1], yO[:, HALF1:]) + b1, 0.0)   # (3*TB, 192)

    # ---- conv2: every tap operand is a contiguous TB-row slice of p1 -------
    def p1(ph):                           # pooled conv1 row ph, whole tile
        ref = p1e_ref if ph % 2 == 0 else p1o_ref
        s = (ph // 2) * tb
        return ref[s:s + tb, :]           # (TB, 192), columns = (pw, c)

    def conv2_rows(oh):                   # conv2 output row oh, whole tile
        acc = jnp.dot(p1(oh), w2_ref[0], preferred_element_type=f32)
        acc += jnp.dot(p1(oh + 1), w2_ref[1], preferred_element_type=f32)
        acc += jnp.dot(p1(oh + 2), w2_ref[2], preferred_element_type=f32)
        return acc                        # (TB, 256), cols packed [ow 0,2 | ow 1,3]

    b2 = b2_ref[...]                      # (1, 128) pre-tiled bias
    h0 = jnp.maximum(conv2_rows(0), conv2_rows(1))             # pooled row 0
    h1 = jnp.maximum(conv2_rows(2), conv2_rows(3))             # pooled row 1
    p2h0 = jnp.maximum(jnp.maximum(h0[:, :HALF2], h0[:, HALF2:]) + b2, 0.0)
    p2h1 = jnp.maximum(jnp.maximum(h1[:, :HALF2], h1[:, HALF2:]) + b2, 0.0)

    # ---- fc1 decomposed over the two pooled-H blocks (no per-sample flatten)
    h = jnp.dot(p2h0, wf1_ref[0], preferred_element_type=f32)
    h += jnp.dot(p2h1, wf1_ref[1], preferred_element_type=f32)
    h = jnp.maximum(h + bf1_ref[...], 0.0)                     # (TB, 256)

    # ---- fc2 + ReLU, lane-dense 128-wide output store ------------------------
    out = jnp.dot(h, wf2_ref[...], preferred_element_type=f32) + bf2_ref[...]
    o_ref[...] = jnp.maximum(out, 0.0)                         # (TB, 128)


# ------------------------- host-side weight packing --------------------------

def _conv1_rhs(w):
    """torch conv1 weight (32,1,3,3) -> tap-merged banded RHS (42, 384).
    K = kh*14 + iw ; N = [even ow | odd ow] blocks of 32 channels."""
    w = w.astype(jnp.float32)
    iw = jnp.arange(H_IN)[:, None]
    ow = jnp.arange(OH1)[None, :]
    j = iw - ow
    valid = (j >= 0) & (j < 3)
    jc = jnp.clip(j, 0, 2)
    taps = []
    for kh in range(3):
        tap = jnp.transpose(w[:, 0, kh, :], (1, 0))            # (3, 32) [kw, co]
        taps.append(jnp.where(valid[..., None], tap[jc], 0.0))  # (14, 12, 32)
    band = jnp.concatenate(taps, axis=0)                        # (42, 12, 32)
    order = jnp.array([0, 2, 4, 6, 8, 10, 1, 3, 5, 7, 9, 11])   # even ow | odd ow
    return band[:, order, :].reshape(K1, N1)                    # (42, 384)


def _conv2_rhs(w):
    """torch conv2 weight (64,32,3,3) -> 3 banded RHS taps, each (192, 256).
    K = pw*32 + c ; N = [ow2 in {0,2} | ow2 in {1,3}] blocks of 64 channels."""
    w = w.astype(jnp.float32)
    pw = jnp.arange(PW1)[:, None]
    ow = jnp.arange(OH2)[None, :]
    j = pw - ow
    valid = (j >= 0) & (j < 3)
    jc = jnp.clip(j, 0, 2)
    order = jnp.array([0, 2, 1, 3])
    mats = []
    for kh in range(3):
        tap = jnp.transpose(w[:, :, kh, :], (2, 1, 0))          # (3, 32, 64) [kw,c,co]
        band = jnp.where(valid[..., None, None], tap[jc], 0.0)  # (6, 4, 32, 64)
        band = band[:, order]                                   # even/odd ow2 halves
        band = jnp.transpose(band, (0, 2, 1, 3))                # (6, 32, 4, 64)
        mats.append(band.reshape(HALF1, N2))                    # (192, 256)
    return jnp.stack(mats, axis=0)                              # (3, 192, 256)


def _fc1_pack(w):
    """torch fc1 weight (200, 256), input index c*4+h*2+w ->
    two RHS blocks (2, 128, 256): [h][w*64+c, n], N padded 200 -> 256."""
    w = w.astype(jnp.float32).reshape(N_FC1, C2, 2, 2)          # [n, c, h, w]
    w = jnp.transpose(w, (2, 3, 1, 0)).reshape(2, 2 * C2, N_FC1)  # [h, w*64+c, n]
    return jnp.pad(w, ((0, 0), (0, 0), (0, FC1P - N_FC1)))


def prepare_params(p):
    """Pack / pad / pre-transpose all weights once (outside the jitted forward)."""
    f32 = lambda v: jnp.asarray(v, jnp.float32)

    def stack(fn, a, b):
        return jnp.stack([fn(p[a]), fn(p[b])], axis=0)

    return {
        'W1':  stack(_conv1_rhs, 'conv1_1_w', 'conv1_2_w'),                   # (2,42,384)
        'b1':  stack(lambda v: jnp.tile(f32(v), PW1)[None, :],
                     'conv1_1_b', 'conv1_2_b'),                               # (2,1,192)
        'W2':  stack(_conv2_rhs, 'conv2_1_w', 'conv2_2_w'),                   # (2,3,192,256)
        'b2':  stack(lambda v: jnp.tile(f32(v), 2)[None, :],
                     'conv2_1_b', 'conv2_2_b'),                               # (2,1,128)
        'Wf1': stack(_fc1_pack, 'fc1_1_w', 'fc1_2_w'),                        # (2,2,128,256)
        'bf1': stack(lambda v: jnp.pad(f32(v), (0, FC1P - N_FC1))[None, :],
                     'fc1_1_b', 'fc1_2_b'),                                   # (2,1,256)
        'Wf2': stack(lambda v: jnp.pad(f32(v).T,
                                       ((0, FC1P - N_FC1), (0, OUTP - N_FC2))),
                     'fc2_1_w', 'fc2_2_w'),                                   # (2,256,128)
        'bf2': stack(lambda v: jnp.pad(f32(v), (0, OUTP - N_FC2))[None, :],
                     'fc2_1_b', 'fc2_2_b'),                                   # (2,1,128)
        'Wf3': f32(p['fc3_w']).T, 'bf3': f32(p['fc3_b']),
        'Wf4': f32(p['fc4_w']).T, 'bf4': f32(p['fc4_b']),
    }


# ------------------------- host-side input packing ---------------------------

def _make_lhs_slabs(xb, nt, tb):
    """(B_pad, 14, 14) -> (nt, 4, 3*TB, 42) tap-merged conv1 LHS row slabs.
    Slab rows are ordered [oh block | oh+4 block | oh+8 block] per batch tile."""
    bp = xb.shape[0]
    win = jnp.stack([xb[:, oh:oh + 3, :].reshape(bp, K1)
                     for oh in range(OH1)], axis=0)             # (12, B_pad, 42)
    grp = win[jnp.array(_GROUP_ROWS)]                           # grouped row order
    grp = grp.reshape(4, 3, nt, tb, K1)
    grp = jnp.transpose(grp, (2, 0, 1, 3, 4))                   # (nt, 4, 3, TB, 42)
    return grp.reshape(nt, 4, 3 * tb, K1)


# ------------------------------- forward pass --------------------------------

def convnet_forward(x, pk):
    """x: (B, 2, 14, 14) NCHW float32.  Returns (B, 2)."""
    B = x.shape[0]
    TB = min(DEFAULT_TB, B)
    nt = -(-B // TB)
    B_pad = nt * TB

    xf = x.astype(jnp.float32)
    if B_pad != B:
        xf = jnp.pad(xf, ((0, B_pad - B), (0, 0), (0, 0), (0, 0)))

    x_slab = jnp.stack([_make_lhs_slabs(xf[:, br], nt, TB) for br in range(2)],
                       axis=0)                                   # (2, nt, 4, 3TB, 42)

    kernel = functools.partial(_branch_kernel, tb=TB)
    wmap3 = lambda br, t: (br, 0, 0)
    wmap4 = lambda br, t: (br, 0, 0, 0)

    branch_out = pl.pallas_call(
        kernel,
        out_shape=jax.ShapeDtypeStruct((2, B_pad, OUTP), jnp.float32),
        grid=(2, nt),
        in_specs=[
            pl.BlockSpec((None, None, 4, 3 * TB, K1),
                         lambda br, t: (br, t, 0, 0, 0)),        # conv1 LHS slabs
            pl.BlockSpec((None, K1, N1), wmap3),                 # W1 (tap-merged)
            pl.BlockSpec((None, 1, HALF1), wmap3),               # b1 (pre-tiled)
            pl.BlockSpec((None, 3, HALF1, N2), wmap4),           # W2 taps
            pl.BlockSpec((None, 1, HALF2), wmap3),               # b2 (pre-tiled)
            pl.BlockSpec((None, 2, HALF2, FC1P), wmap4),         # fc1 (per h block)
            pl.BlockSpec((None, 1, FC1P), wmap3),                # bf1 (padded)
            pl.BlockSpec((None, FC1P, OUTP), wmap3),             # fc2 (padded)
            pl.BlockSpec((None, 1, OUTP), wmap3),                # bf2 (padded)
        ],
        out_specs=pl.BlockSpec((None, TB, OUTP), lambda br, t: (br, t, 0)),
        scratch_shapes=[
            pltpu.VMEM((3 * TB, HALF1), jnp.float32),            # p1 pooled, even rows
            pltpu.VMEM((3 * TB, HALF1), jnp.float32),            # p1 pooled, odd rows
        ],
        compiler_params=pltpu.CompilerParams(
            dimension_semantics=("parallel", "parallel")),
    )(x_slab, pk['W1'], pk['b1'], pk['W2'], pk['b2'],
      pk['Wf1'], pk['bf1'], pk['Wf2'], pk['bf2'])

    # Tiny fusion head (20 -> nh -> 2): plain XLA matmuls, a pallas_call launch
    # would cost more than the compute.
    u = branch_out[0, :B, :N_FC2]
    v = branch_out[1, :B, :N_FC2]
    w = jnp.concatenate([u, v], axis=1)                          # (B, 20)
    w = jnp.maximum(w @ pk['Wf3'] + pk['bf3'], 0.0)
    return w @ pk['Wf4'] + pk['bf4']


# ----------------------- deterministic parameter init ------------------------

def init_params(key, nb_hidden=10):
    def u(k, shape, fan_in):
        bound = 1.0 / (fan_in ** 0.5)
        return jax.random.uniform(k, shape, jnp.float32, -bound, bound)

    ks = jax.random.split(key, 20)
    p = {}
    p['conv1_1_w'] = u(ks[0], (32, 1, 3, 3), 9);    p['conv1_1_b'] = u(ks[1], (32,), 9)
    p['conv2_1_w'] = u(ks[2], (64, 32, 3, 3), 288); p['conv2_1_b'] = u(ks[3], (64,), 288)
    p['conv1_2_w'] = u(ks[4], (32, 1, 3, 3), 9);    p['conv1_2_b'] = u(ks[5], (32,), 9)
    p['conv2_2_w'] = u(ks[6], (64, 32, 3, 3), 288); p['conv2_2_b'] = u(ks[7], (64,), 288)
    p['fc1_1_w'] = u(ks[8], (200, 256), 256);       p['fc1_1_b'] = u(ks[9], (200,), 256)
    p['fc2_1_w'] = u(ks[10], (10, 200), 200);       p['fc2_1_b'] = u(ks[11], (10,), 200)
    p['fc1_2_w'] = u(ks[12], (200, 256), 256);      p['fc1_2_b'] = u(ks[13], (200,), 256)
    p['fc2_2_w'] = u(ks[14], (10, 200), 200);       p['fc2_2_b'] = u(ks[15], (10,), 200)
    p['fc3_w'] = u(ks[16], (nb_hidden, 20), 20);    p['fc3_b'] = u(ks[17], (nb_hidden,), 20)
    p['fc4_w'] = u(ks[18], (2, nb_hidden), nb_hidden)
    p['fc4_b'] = u(ks[19], (2,), nb_hidden)
    return p


# ---------------------------- pure-JAX reference -----------------------------

def reference_forward(x, p):
    def conv(xc, w, b):
        y = jax.lax.conv_general_dilated(
            xc, w, (1, 1), 'VALID',
            dimension_numbers=('NCHW', 'OIHW', 'NCHW'))
        return y + b[None, :, None, None]

    def pool_relu(y):
        B, C, H, W = y.shape
        y = y.reshape(B, C, H // 2, 2, W // 2, 2).max(axis=(3, 5))
        return jnp.maximum(y, 0.0)

    def branch(xc, wc1, bc1, wc2, bc2, wf1, bf1, wf2, bf2):
        h = pool_relu(conv(xc, wc1, bc1))
        h = pool_relu(conv(h, wc2, bc2))
        h = h.reshape(h.shape[0], -1)
        h = jnp.maximum(h @ wf1.T + bf1, 0.0)
        return jnp.maximum(h @ wf2.T + bf2, 0.0)

    u = branch(x[:, 0:1], p['conv1_1_w'], p['conv1_1_b'], p['conv2_1_w'], p['conv2_1_b'],
               p['fc1_1_w'], p['fc1_1_b'], p['fc2_1_w'], p['fc2_1_b'])
    v = branch(x[:, 1:2], p['conv1_2_w'], p['conv1_2_b'], p['conv2_2_w'], p['conv2_2_b'],
               p['fc1_2_w'], p['fc1_2_b'], p['fc2_2_w'], p['fc2_2_b'])
    w = jnp.concatenate([u, v], axis=1)
    w = jnp.maximum(w @ p['fc3_w'].T + p['fc3_b'], 0.0)
    return w @ p['fc4_w'].T + p['fc4_b']


# ------------------------------------ main ------------------------------------

if __name__ == "__main__":
    key = jax.random.PRNGKey(0)
    pkey, xkey = jax.random.split(key)
    params = init_params(pkey, nb_hidden=10)
    x = jax.random.normal(xkey, (2, 2, 14, 14), jnp.float32)   # (B, 2, 14, 14)

    packed = prepare_params(params)
    out = jax.jit(convnet_forward)(x, packed)
    out = jax.block_until_ready(out)
    assert out.shape == (2, 2), out.shape

    ref = reference_forward(x, params)
    err = float(jnp.max(jnp.abs(out - ref)))
    if not jnp.allclose(out, ref, atol=1e-3, rtol=1e-3):
        raise AssertionError(f"Pallas ConvNet mismatch vs JAX reference, max abs err {err}")

    print("KERNEL_OK")
</pallas_src>

<mosaic_0001>
module attributes {stable_mosaic.version = 11 : i64} {
  func.func @_branch_kernel(%arg0: i32, %arg1: i32, %arg2: memref<1x1x4x6x42xf32, #tpu.memory_space<vmem>>, %arg3: memref<1x42x384xf32, #tpu.memory_space<vmem>>, %arg4: memref<1x1x192xf32, #tpu.memory_space<vmem>>, %arg5: memref<1x3x192x256xf32, #tpu.memory_space<vmem>>, %arg6: memref<1x1x128xf32, #tpu.memory_space<vmem>>, %arg7: memref<1x2x128x256xf32, #tpu.memory_space<vmem>>, %arg8: memref<1x1x256xf32, #tpu.memory_space<vmem>>, %arg9: memref<1x256x128xf32, #tpu.memory_space<vmem>>, %arg10: memref<1x1x128xf32, #tpu.memory_space<vmem>>, %arg11: memref<1x2x128xf32, #tpu.memory_space<vmem>>, %arg12: memref<6x192xf32, #tpu.memory_space<vmem>>, %arg13: memref<6x192xf32, #tpu.memory_space<vmem>>) attributes {dimension_semantics = [#tpu.dimension_semantics<parallel>, #tpu.dimension_semantics<parallel>], iteration_bounds = array<i64: 2, 1>, scalar_prefetch = 0 : i64, scratch_operands = 2 : i64, tpu.core_type = #tpu.core_type<tc>, window_params = [{transform_indices = @transform_0, window_bounds = array<i64: 1, 1, 4, 6, 42>}, {transform_indices = @transform_1, window_bounds = array<i64: 1, 42, 384>}, {transform_indices = @transform_2, window_bounds = array<i64: 1, 1, 192>}, {transform_indices = @transform_3, window_bounds = array<i64: 1, 3, 192, 256>}, {transform_indices = @transform_4, window_bounds = array<i64: 1, 1, 128>}, {transform_indices = @transform_5, window_bounds = array<i64: 1, 2, 128, 256>}, {transform_indices = @transform_6, window_bounds = array<i64: 1, 1, 256>}, {transform_indices = @transform_7, window_bounds = array<i64: 1, 256, 128>}, {transform_indices = @transform_8, window_bounds = array<i64: 1, 1, 128>}, {transform_indices = @transform_9, window_bounds = array<i64: 1, 2, 128>}]} {
    %c0 = arith.constant 0 : index
    %c0_0 = arith.constant 0 : index
    %c0_1 = arith.constant 0 : index
    %c0_2 = arith.constant 0 : index
    %c0_3 = arith.constant 0 : index
    %0 = vector.load %arg2[%c0, %c0_0, %c0_1, %c0_2, %c0_3] : memref<1x1x4x6x42xf32, #tpu.memory_space<vmem>>, vector<1x1x1x6x42xf32>
    %1 = vector.shape_cast %0 : vector<1x1x1x6x42xf32> to vector<6x42xf32>
    %c0_4 = arith.constant 0 : index
    %c0_5 = arith.constant 0 : index
    %c0_6 = arith.constant 0 : index
    %2 = vector.load %arg3[%c0_4, %c0_5, %c0_6] : memref<1x42x384xf32, #tpu.memory_space<vmem>>, vector<1x42x384xf32>
    %3 = vector.shape_cast %2 : vector<1x42x384xf32> to vector<42x384xf32>
    %cst = arith.constant dense<0.000000e+00> : vector<6x384xf32>
    %4 = tpu.matmul %1, %3, %cst {dimension_numbers = #tpu.dot_dimension_numbers<[1], [0], [0], [1], [0, 0, 1, 1], [], []>} : vector<6x42xf32>, vector<42x384xf32>, vector<6x384xf32> -> vector<6x384xf32>
    %c0_7 = arith.constant 0 : index
    %c0_8 = arith.constant 0 : index
    %c1 = arith.constant 1 : index
    %c0_9 = arith.constant 0 : index
    %c0_10 = arith.constant 0 : index
    %5 = vector.load %arg2[%c0_7, %c0_8, %c1, %c0_9, %c0_10] : memref<1x1x4x6x42xf32, #tpu.memory_space<vmem>>, vector<1x1x1x6x42xf32>
    %6 = vector.shape_cast %5 : vector<1x1x1x6x42xf32> to vector<6x42xf32>
    %c0_11 = arith.constant 0 : index
    %c0_12 = arith.constant 0 : index
    %c0_13 = arith.constant 0 : index
    %7 = vector.load %arg3[%c0_11, %c0_12, %c0_13] : memref<1x42x384xf32, #tpu.memory_space<vmem>>, vector<1x42x384xf32>
    %8 = vector.shape_cast %7 : vector<1x42x384xf32> to vector<42x384xf32>
    %cst_14 = arith.constant dense<0.000000e+00> : vector<6x384xf32>
    %9 = tpu.matmul %6, %8, %cst_14 {dimension_numbers = #tpu.dot_dimension_numbers<[1], [0], [0], [1], [0, 0, 1, 1], [], []>} : vector<6x42xf32>, vector<42x384xf32>, vector<6x384xf32> -> vector<6x384xf32>
    %c0_15 = arith.constant 0 : index
    %c0_16 = arith.constant 0 : index
    %c2 = arith.constant 2 : index
    %c0_17 = arith.constant 0 : index
    %c0_18 = arith.constant 0 : index
    %10 = vector.load %arg2[%c0_15, %c0_16, %c2, %c0_17, %c0_18] : memref<1x1x4x6x42xf32, #tpu.memory_space<vmem>>, vector<1x1x1x6x42xf32>
    %11 = vector.shape_cast %10 : vector<1x1x1x6x42xf32> to vector<6x42xf32>
    %c0_19 = arith.constant 0 : index
    %c0_20 = arith.constant 0 : index
    %c0_21 = arith.constant 0 : index
    %12 = vector.load %arg3[%c0_19, %c0_20, %c0_21] : memref<1x42x384xf32, #tpu.memory_space<vmem>>, vector<1x42x384xf32>
    %13 = vector.shape_cast %12 : vector<1x42x384xf32> to vector<42x384xf32>
    %cst_22 = arith.constant dense<0.000000e+00> : vector<6x384xf32>
    %14 = tpu.matmul %11, %13, %cst_22 {dimension_numbers = #tpu.dot_dimension_numbers<[1], [0], [0], [1], [0, 0, 1, 1], [], []>} : vector<6x42xf32>, vector<42x384xf32>, vector<6x384xf32> -> vector<6x384xf32>
    %c0_23 = arith.constant 0 : index
    %c0_24 = arith.constant 0 : index
    %c3 = arith.constant 3 : index
    %c0_25 = arith.constant 0 : index
    %c0_26 = arith.constant 0 : index
    %15 = vector.load %arg2[%c0_23, %c0_24, %c3, %c0_25, %c0_26] : memref<1x1x4x6x42xf32, #tpu.memory_space<vmem>>, vector<1x1x1x6x42xf32>
    %16 = vector.shape_cast %15 : vector<1x1x1x6x42xf32> to vector<6x42xf32>
    %c0_27 = arith.constant 0 : index
    %c0_28 = arith.constant 0 : index
    %c0_29 = arith.constant 0 : index
    %17 = vector.load %arg3[%c0_27, %c0_28, %c0_29] : memref<1x42x384xf32, #tpu.memory_space<vmem>>, vector<1x42x384xf32>
    %18 = vector.shape_cast %17 : vector<1x42x384xf32> to vector<42x384xf32>
    %cst_30 = arith.constant dense<0.000000e+00> : vector<6x384xf32>
    %19 = tpu.matmul %16, %18, %cst_30 {dimension_numbers = #tpu.dot_dimension_numbers<[1], [0], [0], [1], [0, 0, 1, 1], [], []>} : vector<6x42xf32>, vector<42x384xf32>, vector<6x384xf32> -> vector<6x384xf32>
    %20 = arith.maximumf %4, %9 : vector<6x384xf32>
    %21 = arith.maximumf %14, %19 : vector<6x384xf32>
    %c0_31 = arith.constant 0 : index
    %c0_32 = arith.constant 0 : index
    %c0_33 = arith.constant 0 : index
    %22 = vector.load %arg4[%c0_31, %c0_32, %c0_33] : memref<1x1x192xf32, #tpu.memory_space<vmem>>, vector<1x1x192xf32>
    %23 = vector.shape_cast %22 : vector<1x1x192xf32> to vector<1x192xf32>
    %24 = vector.extract_strided_slice %20 {offsets = [0, 0], sizes = [6, 192], strides = [1, 1]} : vector<6x384xf32> to vector<6x192xf32>
    %25 = vector.extract_strided_slice %20 {offsets = [0, 192], sizes = [6, 192], strides = [1, 1]} : vector<6x384xf32> to vector<6x192xf32>
    %26 = arith.maximumf %24, %25 : vector<6x192xf32>
    %27 = vector.broadcast %23 : vector<1x192xf32> to vector<6x192xf32>
    %28 = arith.addf %26, %27 : vector<6x192xf32>
    %cst_34 = arith.constant 0.000000e+00 : f32
    %29 = vector.broadcast %cst_34 : f32 to vector<6x192xf32>
    %30 = arith.maximumf %28, %29 : vector<6x192xf32>
    %c0_35 = arith.constant 0 : index
    %c0_36 = arith.constant 0 : index
    %31 = vector.load %arg12[%c0_35, %c0_36] : memref<6x192xf32, #tpu.memory_space<vmem>>, vector<6x192xf32>
    tpu.vector_store %arg12[%c0_35, %c0_36], %30 {strides = array<i32>} : memref<6x192xf32, #tpu.memory_space<vmem>>, vector<6x192xf32>,
    %32 = vector.extract_strided_slice %21 {offsets = [0, 0], sizes = [6, 192], strides = [1, 1]} : vector<6x384xf32> to vector<6x192xf32>
    %33 = vector.extract_strided_slice %21 {offsets = [0, 192], sizes = [6, 192], strides = [1, 1]} : vector<6x384xf32> to vector<6x192xf32>
    %34 = arith.maximumf %32, %33 : vector<6x192xf32>
    %35 = vector.broadcast %23 : vector<1x192xf32> to vector<6x192xf32>
    %36 = arith.addf %34, %35 : vector<6x192xf32>
    %cst_37 = arith.constant 0.000000e+00 : f32
    %37 = vector.broadcast %cst_37 : f32 to vector<6x192xf32>
    %38 = arith.maximumf %36, %37 : vector<6x192xf32>
    %c0_38 = arith.constant 0 : index
    %c0_39 = arith.constant 0 : index
    %39 = vector.load %arg13[%c0_38, %c0_39] : memref<6x192xf32, #tpu.memory_space<vmem>>, vector<6x192xf32>
    tpu.vector_store %arg13[%c0_38, %c0_39], %38 {strides = array<i32>} : memref<6x192xf32, #tpu.memory_space<vmem>>, vector<6x192xf32>,
    %c0_40 = arith.constant 0 : index
    %c0_41 = arith.constant 0 : index
    %c0_42 = arith.constant 0 : index
    %40 = vector.load %arg6[%c0_40, %c0_41, %c0_42] : memref<1x1x128xf32, #tpu.memory_space<vmem>>, vector<1x1x128xf32>
    %41 = vector.shape_cast %40 : vector<1x1x128xf32> to vector<1x128xf32>
    %c0_43 = arith.constant 0 : index
    %c0_44 = arith.constant 0 : index
    %42 = vector.load %arg12[%c0_43, %c0_44] : memref<6x192xf32, #tpu.memory_space<vmem>>, vector<2x192xf32>
    %c0_45 = arith.constant 0 : index
    %c0_46 = arith.constant 0 : index
    %c0_47 = arith.constant 0 : index
    %c0_48 = arith.constant 0 : index
    %43 = vector.load %arg5[%c0_45, %c0_46, %c0_47, %c0_48] : memref<1x3x192x256xf32, #tpu.memory_space<vmem>>, vector<1x1x192x256xf32>
    %44 = vector.shape_cast %43 : vector<1x1x192x256xf32> to vector<192x256xf32>
    %cst_49 = arith.constant dense<0.000000e+00> : vector<2x256xf32>
    %45 = tpu.matmul %42, %44, %cst_49 {dimension_numbers = #tpu.dot_dimension_numbers<[1], [0], [0], [1], [0, 0, 1, 1], [], []>} : vector<2x192xf32>, vector<192x256xf32>, vector<2x256xf32> -> vector<2x256xf32>
    %c0_50 = arith.constant 0 : index
    %c0_51 = arith.constant 0 : index
    %46 = vector.load %arg13[%c0_50, %c0_51] : memref<6x192xf32, #tpu.memory_space<vmem>>, vector<2x192xf32>
    %c0_52 = arith.constant 0 : index
    %c1_53 = arith.constant 1 : index
    %c0_54 = arith.constant 0 : index
    %c0_55 = arith.constant 0 : index
    %47 = vector.load %arg5[%c0_52, %c1_53, %c0_54, %c0_55] : memref<1x3x192x256xf32, #tpu.memory_space<vmem>>, vector<1x1x192x256xf32>
    %48 = vector.shape_cast %47 : vector<1x1x192x256xf32> to vector<192x256xf32>
    %cst_56 = arith.constant dense<0.000000e+00> : vector<2x256xf32>
    %49 = tpu.matmul %46, %48, %cst_56 {dimension_numbers = #tpu.dot_dimension_numbers<[1], [0], [0], [1], [0, 0, 1, 1], [], []>} : vector<2x192xf32>, vector<192x256xf32>, vector<2x256xf32> -> vector<2x256xf32>
    %50 = arith.addf %45, %49 : vector<2x256xf32>
    %c2_57 = arith.constant 2 : index
    %c0_58 = arith.constant 0 : index
    %51 = vector.load %arg12[%c2_57, %c0_58] : memref<6x192xf32, #tpu.memory_space<vmem>>, vector<2x192xf32>
    %c0_59 = arith.constant 0 : index
    %c2_60 = arith.constant 2 : index
    %c0_61 = arith.constant 0 : index
    %c0_62 = arith.constant 0 : index
    %52 = vector.load %arg5[%c0_59, %c2_60, %c0_61, %c0_62] : memref<1x3x192x256xf32, #tpu.memory_space<vmem>>, vector<1x1x192x256xf32>
    %53 = vector.shape_cast %52 : vector<1x1x192x256xf32> to vector<192x256xf32>
    %cst_63 = arith.constant dense<0.000000e+00> : vector<2x256xf32>
    %54 = tpu.matmul %51, %53, %cst_63 {dimension_numbers = #tpu.dot_dimension_numbers<[1], [0], [0], [1], [0, 0, 1, 1], [], []>} : vector<2x192xf32>, vector<192x256xf32>, vector<2x256xf32> -> vector<2x256xf32>
    %55 = arith.addf %50, %54 : vector<2x256xf32>
    %c0_64 = arith.constant 0 : index
    %c0_65 = arith.constant 0 : index
    %56 = vector.load %arg13[%c0_64, %c0_65] : memref<6x192xf32, #tpu.memory_space<vmem>>, vector<2x192xf32>
    %c0_66 = arith.constant 0 : index
    %c0_67 = arith.constant 0 : index
    %c0_68 = arith.constant 0 : index
    %c0_69 = arith.constant 0 : index
    %57 = vector.load %arg5[%c0_66, %c0_67, %c0_68, %c0_69] : memref<1x3x192x256xf32, #tpu.memory_space<vmem>>, vector<1x1x192x256xf32>
    %58 = vector.shape_cast %57 : vector<1x1x192x256xf32> to vector<192x256xf32>
    %cst_70 = arith.constant dense<0.000000e+00> : vector<2x256xf32>
    %59 = tpu.matmul %56, %58, %cst_70 {dimension_numbers = #tpu.dot_dimension_numbers<[1], [0], [0], [1], [0, 0, 1, 1], [], []>} : vector<2x192xf32>, vector<192x256xf32>, vector<2x256xf32> -> vector<2x256xf32>
    %c2_71 = arith.constant 2 : index
    %c0_72 = arith.constant 0 : index
    %60 = vector.load %arg12[%c2_71, %c0_72] : memref<6x192xf32, #tpu.memory_space<vmem>>, vector<2x192xf32>
    %c0_73 = arith.constant 0 : index
    %c1_74 = arith.constant 1 : index
    %c0_75 = arith.constant 0 : index
    %c0_76 = arith.constant 0 : index
    %61 = vector.load %arg5[%c0_73, %c1_74, %c0_75, %c0_76] : memref<1x3x192x256xf32, #tpu.memory_space<vmem>>, vector<1x1x192x256xf32>
    %62 = vector.shape_cast %61 : vector<1x1x192x256xf32> to vector<192x256xf32>
    %cst_77 = arith.constant dense<0.000000e+00> : vector<2x256xf32>
    %63 = tpu.matmul %60, %62, %cst_77 {dimension_numbers = #tpu.dot_dimension_numbers<[1], [0], [0], [1], [0, 0, 1, 1], [], []>} : vector<2x192xf32>, vector<192x256xf32>, vector<2x256xf32> -> vector<2x256xf32>
    %64 = arith.addf %59, %63 : vector<2x256xf32>
    %c2_78 = arith.constant 2 : index
    %c0_79 = arith.constant 0 : index
    %65 = vector.load %arg13[%c2_78, %c0_79] : memref<6x192xf32, #tpu.memory_space<vmem>>, vector<2x192xf32>
    %c0_80 = arith.constant 0 : index
    %c2_81 = arith.constant 2 : index
    %c0_82 = arith.constant 0 : index
    %c0_83 = arith.constant 0 : index
    %66 = vector.load %arg5[%c0_80, %c2_81, %c0_82, %c0_83] : memref<1x3x192x256xf32, #tpu.memory_space<vmem>>, vector<1x1x192x256xf32>
    %67 = vector.shape_cast %66 : vector<1x1x192x256xf32> to vector<192x256xf32>
    %cst_84 = arith.constant dense<0.000000e+00> : vector<2x256xf32>
    %68 = tpu.matmul %65, %67, %cst_84 {dimension_numbers = #tpu.dot_dimension_numbers<[1], [0], [0], [1], [0, 0, 1, 1], [], []>} : vector<2x192xf32>, vector<192x256xf32>, vector<2x256xf32> -> vector<2x256xf32>
    %69 = arith.addf %64, %68 : vector<2x256xf32>
    %70 = arith.maximumf %55, %69 : vector<2x256xf32>
    %c2_85 = arith.constant 2 : index
    %c0_86 = arith.constant 0 : index
    %71 = vector.load %arg12[%c2_85, %c0_86] : memref<6x192xf32, #tpu.memory_space<vmem>>, vector<2x192xf32>
    %c0_87 = arith.constant 0 : index
    %c0_88 = arith.constant 0 : index
    %c0_89 = arith.constant 0 : index
    %c0_90 = arith.constant 0 : index
    %72 = vector.load %arg5[%c0_87, %c0_88, %c0_89, %c0_90] : memref<1x3x192x256xf32, #tpu.memory_space<vmem>>, vector<1x1x192x256xf32>
    %73 = vector.shape_cast %72 : vector<1x1x192x256xf32> to vector<192x256xf32>
    %cst_91 = arith.constant dense<0.000000e+00> : vector<2x256xf32>
    %74 = tpu.matmul %71, %73, %cst_91 {dimension_numbers = #tpu.dot_dimension_numbers<[1], [0], [0], [1], [0, 0, 1, 1], [], []>} : vector<2x192xf32>, vector<192x256xf32>, vector<2x256xf32> -> vector<2x256xf32>
    %c2_92 = arith.constant 2 : index
    %c0_93 = arith.constant 0 : index
    %75 = vector.load %arg13[%c2_92, %c0_93] : memref<6x192xf32, #tpu.memory_space<vmem>>, vector<2x192xf32>
    %c0_94 = arith.constant 0 : index
    %c1_95 = arith.constant 1 : index
    %c0_96 = arith.constant 0 : index
    %c0_97 = arith.constant 0 : index
    %76 = vector.load %arg5[%c0_94, %c1_95, %c0_96, %c0_97] : memref<1x3x192x256xf32, #tpu.memory_space<vmem>>, vector<1x1x192x256xf32>
    %77 = vector.shape_cast %76 : vector<1x1x192x256xf32> to vector<192x256xf32>
    %cst_98 = arith.constant dense<0.000000e+00> : vector<2x256xf32>
    %78 = tpu.matmul %75, %77, %cst_98 {dimension_numbers = #tpu.dot_dimension_numbers<[1], [0], [0], [1], [0, 0, 1, 1], [], []>} : vector<2x192xf32>, vector<192x256xf32>, vector<2x256xf32> -> vector<2x256xf32>
    %79 = arith.addf %74, %78 : vector<2x256xf32>
    %c4 = arith.constant 4 : index
    %c0_99 = arith.constant 0 : index
    %80 = vector.load %arg12[%c4, %c0_99] : memref<6x192xf32, #tpu.memory_space<vmem>>, vector<2x192xf32>
    %c0_100 = arith.constant 0 : index
    %c2_101 = arith.constant 2 : index
    %c0_102 = arith.constant 0 : index
    %c0_103 = arith.constant 0 : index
    %81 = vector.load %arg5[%c0_100, %c2_101, %c0_102, %c0_103] : memref<1x3x192x256xf32, #tpu.memory_space<vmem>>, vector<1x1x192x256xf32>
    %82 = vector.shape_cast %81 : vector<1x1x192x256xf32> to vector<192x256xf32>
    %cst_104 = arith.constant dense<0.000000e+00> : vector<2x256xf32>
    %83 = tpu.matmul %80, %82, %cst_104 {dimension_numbers = #tpu.dot_dimension_numbers<[1], [0], [0], [1], [0, 0, 1, 1], [], []>} : vector<2x192xf32>, vector<192x256xf32>, vector<2x256xf32> -> vector<2x256xf32>
    %84 = arith.addf %79, %83 : vector<2x256xf32>
    %c2_105 = arith.constant 2 : index
    %c0_106 = arith.constant 0 : index
    %85 = vector.load %arg13[%c2_105, %c0_106] : memref<6x192xf32, #tpu.memory_space<vmem>>, vector<2x192xf32>
    %c0_107 = arith.constant 0 : index
    %c0_108 = arith.constant 0 : index
    %c0_109 = arith.constant 0 : index
    %c0_110 = arith.constant 0 : index
    %86 = vector.load %arg5[%c0_107, %c0_108, %c0_109, %c0_110] : memref<1x3x192x256xf32, #tpu.memory_space<vmem>>, vector<1x1x192x256xf32>
    %87 = vector.shape_cast %86 : vector<1x1x192x256xf32> to vector<192x256xf32>
    %cst_111 = arith.constant dense<0.000000e+00> : vector<2x256xf32>
    %88 = tpu.matmul %85, %87, %cst_111 {dimension_numbers = #tpu.dot_dimension_numbers<[1], [0], [0], [1], [0, 0, 1, 1], [], []>} : vector<2x192xf32>, vector<192x256xf32>, vector<2x256xf32> -> vector<2x256xf32>
    %c4_112 = arith.constant 4 : index
    %c0_113 = arith.constant 0 : index
    %89 = vector.load %arg12[%c4_112, %c0_113] : memref<6x192xf32, #tpu.memory_space<vmem>>, vector<2x192xf32>
    %c0_114 = arith.constant 0 : index
    %c1_115 = arith.constant 1 : index
    %c0_116 = arith.constant 0 : index
    %c0_117 = arith.constant 0 : index
    %90 = vector.load %arg5[%c0_114, %c1_115, %c0_116, %c0_117] : memref<1x3x192x256xf32, #tpu.memory_space<vmem>>, vector<1x1x192x256xf32>
    %91 = vector.shape_cast %90 : vector<1x1x192x256xf32> to vector<192x256xf32>
    %cst_118 = arith.constant dense<0.000000e+00> : vector<2x256xf32>
    %92 = tpu.matmul %89, %91, %cst_118 {dimension_numbers = #tpu.dot_dimension_numbers<[1], [0], [0], [1], [0, 0, 1, 1], [], []>} : vector<2x192xf32>, vector<192x256xf32>, vector<2x256xf32> -> vector<2x256xf32>
    %93 = arith.addf %88, %92 : vector<2x256xf32>
    %c4_119 = arith.constant 4 : index
    %c0_120 = arith.constant 0 : index
    %94 = vector.load %arg13[%c4_119, %c0_120] : memref<6x192xf32, #tpu.memory_space<vmem>>, vector<2x192xf32>
    %c0_121 = arith.constant 0 : index
    %c2_122 = arith.constant 2 : index
    %c0_123 = arith.constant 0 : index
    %c0_124 = arith.constant 0 : index
    %95 = vector.load %arg5[%c0_121, %c2_122, %c0_123, %c0_124] : memref<1x3x192x256xf32, #tpu.memory_space<vmem>>, vector<1x1x192x256xf32>
    %96 = vector.shape_cast %95 : vector<1x1x192x256xf32> to vector<192x256xf32>
    %cst_125 = arith.constant dense<0.000000e+00> : vector<2x256xf32>
    %97 = tpu.matmul %94, %96, %cst_125 {dimension_numbers = #tpu.dot_dimension_numbers<[1], [0], [0], [1], [0, 0, 1, 1], [], []>} : vector<2x192xf32>, vector<192x256xf32>, vector<2x256xf32> -> vector<2x256xf32>
    %98 = arith.addf %93, %97 : vector<2x256xf32>
    %99 = arith.maximumf %84, %98 : vector<2x256xf32>
    %100 = vector.extract_strided_slice %70 {offsets = [0, 0], sizes = [2, 128], strides = [1, 1]} : vector<2x256xf32> to vector<2x128xf32>
    %101 = vector.extract_strided_slice %70 {offsets = [0, 128], sizes = [2, 128], strides = [1, 1]} : vector<2x256xf32> to vector<2x128xf32>
    %102 = arith.maximumf %100, %101 : vector<2x128xf32>
    %103 = vector.broadcast %41 : vector<1x128xf32> to vector<2x128xf32>
    %104 = arith.addf %102, %103 : vector<2x128xf32>
    %cst_126 = arith.constant 0.000000e+00 : f32
    %105 = vector.broadcast %cst_126 : f32 to vector<2x128xf32>
    %106 = arith.maximumf %104, %105 : vector<2x128xf32>
    %107 = vector.extract_strided_slice %99 {offsets = [0, 0], sizes = [2, 128], strides = [1, 1]} : vector<2x256xf32> to vector<2x128xf32>
    %108 = vector.extract_strided_slice %99 {offsets = [0, 128], sizes = [2, 128], strides = [1, 1]} : vector<2x256xf32> to vector<2x128xf32>
    %109 = arith.maximumf %107, %108 : vector<2x128xf32>
    %110 = vector.broadcast %41 : vector<1x128xf32> to vector<2x128xf32>
    %111 = arith.addf %109, %110 : vector<2x128xf32>
    %cst_127 = arith.constant 0.000000e+00 : f32
    %112 = vector.broadcast %cst_127 : f32 to vector<2x128xf32>
    %113 = arith.maximumf %111, %112 : vector<2x128xf32>
    %c0_128 = arith.constant 0 : index
    %c0_129 = arith.constant 0 : index
    %c0_130 = arith.constant 0 : index
    %c0_131 = arith.constant 0 : index
    %114 = vector.load %arg7[%c0_128, %c0_129, %c0_130, %c0_131] : memref<1x2x128x256xf32, #tpu.memory_space<vmem>>, vector<1x1x128x256xf32>
    %115 = vector.shape_cast %114 : vector<1x1x128x256xf32> to vector<128x256xf32>
    %cst_132 = arith.constant dense<0.000000e+00> : vector<2x256xf32>
    %116 = tpu.matmul %106, %115, %cst_132 {dimension_numbers = #tpu.dot_dimension_numbers<[1], [0], [0], [1], [0, 0, 1, 1], [], []>} : vector<2x128xf32>, vector<128x256xf32>, vector<2x256xf32> -> vector<2x256xf32>
    %c0_133 = arith.constant 0 : index
    %c1_134 = arith.constant 1 : index
    %c0_135 = arith.constant 0 : index
    %c0_136 = arith.constant 0 : index
    %117 = vector.load %arg7[%c0_133, %c1_134, %c0_135, %c0_136] : memref<1x2x128x256xf32, #tpu.memory_space<vmem>>, vector<1x1x128x256xf32>
    %118 = vector.shape_cast %117 : vector<1x1x128x256xf32> to vector<128x256xf32>
    %cst_137 = arith.constant dense<0.000000e+00> : vector<2x256xf32>
    %119 = tpu.matmul %113, %118, %cst_137 {dimension_numbers = #tpu.dot_dimension_numbers<[1], [0], [0], [1], [0, 0, 1, 1], [], []>} : vector<2x128xf32>, vector<128x256xf32>, vector<2x256xf32> -> vector<2x256xf32>
    %120 = arith.addf %116, %119 : vector<2x256xf32>
    %c0_138 = arith.constant 0 : index
    %c0_139 = arith.constant 0 : index
    %c0_140 = arith.constant 0 : index
    %121 = vector.load %arg8[%c0_138, %c0_139, %c0_140] : memref<1x1x256xf32, #tpu.memory_space<vmem>>, vector<1x1x256xf32>
    %122 = vector.shape_cast %121 : vector<1x1x256xf32> to vector<1x256xf32>
    %123 = vector.broadcast %122 : vector<1x256xf32> to vector<2x256xf32>
    %124 = arith.addf %120, %123 : vector<2x256xf32>
    %cst_141 = arith.constant 0.000000e+00 : f32
    %125 = vector.broadcast %cst_141 : f32 to vector<2x256xf32>
    %126 = arith.maximumf %124, %125 : vector<2x256xf32>
    %c0_142 = arith.constant 0 : index
    %c0_143 = arith.constant 0 : index
    %c0_144 = arith.constant 0 : index
    %127 = vector.load %arg9[%c0_142, %c0_143, %c0_144] : memref<1x256x128xf32, #tpu.memory_space<vmem>>, vector<1x256x128xf32>
    %128 = vector.shape_cast %127 : vector<1x256x128xf32> to vector<256x128xf32>
    %cst_145 = arith.constant dense<0.000000e+00> : vector<2x128xf32>
    %129 = tpu.matmul %126, %128, %cst_145 {dimension_numbers = #tpu.dot_dimension_numbers<[1], [0], [0], [1], [0, 0, 1, 1], [], []>} : vector<2x256xf32>, vector<256x128xf32>, vector<2x128xf32> -> vector<2x128xf32>
    %c0_146 = arith.constant 0 : index
    %c0_147 = arith.constant 0 : index
    %c0_148 = arith.constant 0 : index
    %130 = vector.load %arg10[%c0_146, %c0_147, %c0_148] : memref<1x1x128xf32, #tpu.memory_space<vmem>>, vector<1x1x128xf32>
    %131 = vector.shape_cast %130 : vector<1x1x128xf32> to vector<1x128xf32>
    %132 = vector.broadcast %131 : vector<1x128xf32> to vector<2x128xf32>
    %133 = arith.addf %129, %132 : vector<2x128xf32>
    %cst_149 = arith.constant 0.000000e+00 : f32
    %134 = vector.broadcast %cst_149 : f32 to vector<2x128xf32>
    %135 = arith.maximumf %133, %134 : vector<2x128xf32>
    %c0_150 = arith.constant 0 : index
    %c0_151 = arith.constant 0 : index
    %c0_152 = arith.constant 0 : index
    %136 = vector.load %arg11[%c0_150, %c0_151, %c0_152] : memref<1x2x128xf32, #tpu.memory_space<vmem>>, vector<1x2x128xf32>
    %137 = vector.shape_cast %136 : vector<1x2x128xf32> to vector<2x128xf32>
    %138 = vector.shape_cast %135 : vector<2x128xf32> to vector<1x2x128xf32>
    tpu.vector_store %arg11[%c0_150, %c0_151, %c0_152], %138 {strides = array<i32>} : memref<1x2x128xf32, #tpu.memory_space<vmem>>, vector<1x2x128xf32>,
    return
  }
  func.func @transform_0(%arg0: i32, %arg1: i32) -> (i32, i32, i32, i32, i32) {
    %c0_i32 = arith.constant 0 : i32
    %c0_i32_0 = arith.constant 0 : i32
    %c0_i32_1 = arith.constant 0 : i32
    %c0_i32_2 = arith.constant 0 : i32
    return %arg0, %arg1, %c0_i32, %c0_i32_0, %c0_i32_1 : i32, i32, i32, i32, i32
  }
  func.func @transform_1(%arg0: i32, %arg1: i32) -> (i32, i32, i32) {
    %c0_i32 = arith.constant 0 : i32
    %c0_i32_0 = arith.constant 0 : i32
    %c0_i32_1 = arith.constant 0 : i32
    return %arg0, %c0_i32, %c0_i32_0 : i32, i32, i32
  }
  func.func @transform_2(%arg0: i32, %arg1: i32) -> (i32, i32, i32) {
    %c0_i32 = arith.constant 0 : i32
    %c0_i32_0 = arith.constant 0 : i32
    %c0_i32_1 = arith.constant 0 : i32
    return %arg0, %c0_i32, %c0_i32_0 : i32, i32, i32
  }
  func.func @transform_3(%arg0: i32, %arg1: i32) -> (i32, i32, i32, i32) {
    %c0_i32 = arith.constant 0 : i32
    %c0_i32_0 = arith.constant 0 : i32
    %c0_i32_1 = arith.constant 0 : i32
    %c0_i32_2 = arith.constant 0 : i32
    return %arg0, %c0_i32, %c0_i32_0, %c0_i32_1 : i32, i32, i32, i32
  }
  func.func @transform_4(%arg0: i32, %arg1: i32) -> (i32, i32, i32) {
    %c0_i32 = arith.constant 0 : i32
    %c0_i32_0 = arith.constant 0 : i32
    %c0_i32_1 = arith.constant 0 : i32
    return %arg0, %c0_i32, %c0_i32_0 : i32, i32, i32
  }
  func.func @transform_5(%arg0: i32, %arg1: i32) -> (i32, i32, i32, i32) {
    %c0_i32 = arith.constant 0 : i32
    %c0_i32_0 = arith.constant 0 : i32
    %c0_i32_1 = arith.constant 0 : i32
    %c0_i32_2 = arith.constant 0 : i32
    return %arg0, %c0_i32, %c0_i32_0, %c0_i32_1 : i32, i32, i32, i32
  }
  func.func @transform_6(%arg0: i32, %arg1: i32) -> (i32, i32, i32) {
    %c0_i32 = arith.constant 0 : i32
    %c0_i32_0 = arith.constant 0 : i32
    %c0_i32_1 = arith.constant 0 : i32
    return %arg0, %c0_i32, %c0_i32_0 : i32, i32, i32
  }
  func.func @transform_7(%arg0: i32, %arg1: i32) -> (i32, i32, i32) {
    %c0_i32 = arith.constant 0 : i32
    %c0_i32_0 = arith.constant 0 : i32
    %c0_i32_1 = arith.constant 0 : i32
    return %arg0, %c0_i32, %c0_i32_0 : i32, i32, i32
  }
  func.func @transform_8(%arg0: i32, %arg1: i32) -> (i32, i32, i32) {
    %c0_i32 = arith.constant 0 : i32
    %c0_i32_0 = arith.constant 0 : i32
    %c0_i32_1 = arith.constant 0 : i32
    return %arg0, %c0_i32, %c0_i32_0 : i32, i32, i32
  }
  func.func @transform_9(%arg0: i32, %arg1: i32) -> (i32, i32, i32) {
    %c0_i32 = arith.constant 0 : i32
    %c0_i32_0 = arith.constant 0 : i32
    return %arg0, %arg1, %c0_i32 : i32, i32, i32
  }
}

</mosaic_0001>

<bundles_post_ra>
// kernel: convnet_forward.1
= control target key start
LH: loop header
LB: loop body
LE: loop exit
PB: predicated region body
PF: predicated region fallthrough
CT: control target
= control target key end

     0   :  { %s5525_s0 = inlined_call_operand.vmem [shape: f32[2,1,4,6,42], index: 0, kind: input, shape index: {}]   ;;  %s5526_s1 = inlined_call_operand.vmem [shape: f32[2,42,384], index: 1, kind: input, shape index: {}]   ;;  %s5527_s2 = inlined_call_operand.hbm [shape: f32[2,1,192], index: 2, kind: input, shape index: {}]   ;;  %s5528_s3 = inlined_call_operand.hbm [shape: f32[2,3,192,256], index: 3, kind: input, shape index: {}]   ;;  %s5529_s4 = inlined_call_operand.hbm [shape: f32[2,1,128], index: 4, kind: input, shape index: {}]   ;;  %s5530_s5 = inlined_call_operand.vmem [shape: f32[2,2,128,256], index: 5, kind: input, shape index: {}]   ;;  %s5531_s6 = inlined_call_operand.hbm [shape: f32[2,1,256], index: 6, kind: input, shape index: {}]   ;;  %s5532_s7 = inlined_call_operand.vmem [shape: f32[2,256,128], index: 7, kind: input, shape index: {}]   ;;  %s5533_s8 = inlined_call_operand.hbm [shape: f32[2,1,128], index: 8, kind: input, shape index: {}]   ;;  %s5534_s9 = inlined_call_operand.vmem [shape: f32[2,2,128], index: 9, kind: output, shape index: {}]  }
   0x1   :  { %5587 = sst [smem:[#allocation37_spill]] %s5528_s3 }
   0x2   :  { %5588 = sst [smem:[#allocation38_spill]] %s5531_s6 }
   0x3   :  { %14 = vsyncpa [#allocation5], 0 }
   0x4   :  { %16 = vsyncpa [#allocation5 + $0x1], 0 }
   0x5   :  { %17 = vsyncpa [#allocation7], 0 }
   0x6   :  { %19 = vsyncpa [#allocation7 + $0x1], 0 }
   0x7   :  { %20 = vsyncpa [#allocation10], 0 }
   0x8   :  { %22 = vsyncpa [#allocation10 + $0x1], 0  ;;  %s4355_s30 = smov 0   ;;  %s4357_s10 = smov 0  }
   0x9   :  { %s4359_s11 = smov 0   ;;  %s4361_s12 = smov 0  }
   0xa   :  { %s4363_s13 = smov 0   ;;  %s4365_s14 = smov 0  }
   0xb LB: > { %5589 = sst [smem:[#allocation15_spill]] %s4279_s11  ;;  %s5535_s15 = sadd.s32 4294967295, %s4291_s14   ;;  %s4291_s14 = sphi %s4365_s14, %s28_s14   ;;  %s4287_s13 = sphi %s4363_s13, %s5657_s13   ;;  %s4283_s12 = sphi %s4361_s12, %s5656_s12   ;;  %s4279_s11 = sphi %s4359_s11, %s5652_s11   ;;  %s4275_s10 = sphi %s4357_s10, %s5655_s10   ;;  %s4271_s30 = sphi %s4355_s30, %s5654_s30  }
   0xc   : > { %s40_s16 = sadd.s32 1, %s4287_s13  ;;  %s101_s17 = sadd.s32 1, %s4279_s11 }
   0xd   : > { %p42_p0 = scmp.ge.s32.totalorder %s40_s16, 2  ;;  %p108_p1 = scmp.ne.s32.totalorder %s4279_s11, %s4275_s10 }
   0xe   : > { %p109_p2 = scmp.eq.s32.totalorder %s4291_s14, 0  ;;  %p114_p4 = scmp.ne.s32.totalorder %s4275_s10, %s4271_s30 }
   0xf   : > { %s5659_s16 = smov (%p42_p0, %s40_s16), 0  ;;  %p115_p5 = scmp.eq.s32.totalorder %s5535_s15, 0 }
  0x10   : > { %5590 = sst [smem:[#allocation16_spill]] %s5659_s16  ;;  %p110_p3 = por %p109_p2, %p108_p1 }
  0x11   : > { %s98_s18 = ssub.s32 %s4287_s13, %s5659_s16  ;;  %p4396_p7 = por %p115_p5, %p114_p4 }
  0x12   : > { %p99_p6 = scmp.eq.s32.totalorder %s98_s18, 0  ;;  %p4027_p8 = scmp.lt.s32.totalorder %s4291_s14, 2 }
  0x13   : > { %s5591_s19 = scalar_select %p4396_p7, 1, 0 }
  0x14   : > { %s4402_s20 = scalar_select %p99_p6, %s4279_s11, %s101_s17  }
  0x15   : > { %s4405_s21 = sand.u32 1, %s4279_s11   ;;  %p4407_p9 = pnand %p4027_p8, %p110_p3 }
  0x16   : > { %5592 = sst [smem:[#allocation17_spill]] %s4402_s20  ;;  %s5536_s23 = sand.u32 1, %s4291_s14  }
  0x17   : > { %s5593_s22 = scalar_select %p4407_p9, 1, 0 }
  0x18   : > { %s3997_s24 = smul.u32 1152, %s4405_s21  ;;  %s5594_s3 = sld [smem:[#allocation37_spill]] }
  0x19   : > { %s3998_s25 = smul.u32 18432, %s4287_s13  ;;  %s4424_s17 = scalar_lea.sflag [#allocation7], %s5536_s23 }
  0x1a   : > { %s365_s26 = scalar_lea.vmem [#allocation6], %s3997_s24  ;;  %p4430_p12 = pneg %p4407_p9 }
  0x1b   : > { %s372_s27 = sshll.u32 %s365_s26, 4  ;;  %s4419_s27 = int_to_ptr.vmem [resolvable:$true] %s372_s27 }
  0x1e   : > { %s4417_s30 = scalar_lea.hbm %s5594_s3, %s3998_s25  ;;  %s4088_s28 = scalar_lea.hbm %s5594_s3, 36864 }
  0x1f   : > { %s4083_s18 = scalar_lea.hbm %s4417_s30, 18432  ;;  %p4089_p1 = scmp.lt.u32.totalorder %s4417_s30, %s5594_s3 }
  0x20   : > { %p4084_p11 = scmp.ne.s32.totalorder %s4417_s30, %s4083_s18  ;;  %p4090_p2 = scmp.lt.u32.totalorder %s4088_s28, %s4083_s18 }
  0x21   : > { %p4092_p4 = scmp.lt.u32.totalorder %s4083_s18, %s4417_s30 }
  0x22   : > { %p4086_p13 = pnand %p4430_p12, %p4084_p11  ;;  %p4091_p3 = por %p4090_p2, %p4089_p1 }
  0x24   : > { %p4087_p0 = pneg %p4086_p13  ;;  %p4093_p5 = por %p4092_p4, %p4091_p3 }
  0x26   : > { %p4094_p6 = pnand %p4093_p5, %p4087_p0 }
  0x28   : > { %4097 = shalt.err (!%p4094_p6)
}
  0x29   : > { %s4098_s23 = scalar_lea.vmem %s4419_s27, 18432  ;;  %s4293_s25 = smov [#allocation6]  }
  0x2a   : > { %p4099_p8 = scmp.ne.s32.totalorder %s4419_s27, %s4098_s23  ;;  %s4103_s26 = sshll.u32 %s4293_s25, 4  ;;  %s4104_s26 = int_to_ptr.vmem [resolvable:$false] %s4103_s26 }
  0x2b   : > { %s4105_s15 = scalar_lea.vmem %s4104_s26, 36864  ;;  %p4106_p10 = scmp.lt.s32.totalorder %s4419_s27, %s4104_s26 }
  0x2c   : > { %p4101_p11 = pnand %p4099_p8, %p4430_p12  ;;  %p4107_p7 = scmp.lt.s32.totalorder %s4105_s15, %s4098_s23 }
  0x2e   : > { %p4102_p13 = pneg %p4101_p11  ;;  %p4108_p1 = por %p4107_p7, %p4106_p10 }
  0x30   : > { %p4109_p2 = pnand %p4108_p1, %p4102_p13 }
  0x32   : > { %4112 = shalt.err (!%p4109_p2)
}
  0x33   : > { %s4294_s18 = smov 256   ;;  %s4295_s28 = smov 16  }
  0x34   : > { %4017 = dma.hbm_to_vmem [thread:$0]  (!%p4407_p9), %s4417_s30, 18432, %s4419_s27, %s4424_s17, %s4294_s18, %s4294_s18, %s4295_s28  }
  0x35   : > { %p449_p0 = scmp.lt.s32.totalorder %s4291_s14, 3  ;;  %s5541_s23 = sshll.u32 %s4405_s21, 1 }
  0x36   : > { %s5539_s29 = sshll.u32 %s4287_s13, 5  ;;  %p5596_p7 = scmp.ge.s32.totalorder %s4291_s14, 1 }
  0x37   : > { %s5598_s6 = sld [smem:[#allocation38_spill]]  ;;  %s411_s27 = scalar_lea.vmem [#allocation9], %s5541_s23 }
  0x38   : > { %p4459_p10 = pnand %p5596_p7, %p449_p0  ;;  %s419_s30 = sshll.u32 %s411_s27, 4  ;;  %s420_s30 = int_to_ptr.vmem [resolvable:$true] %s419_s30 }
  0x39   : > { %s5599_s18 = sand.u32 1, %s4291_s14  }
  0x3a   : > { %s5597_s25 = scalar_select %p4459_p10, 1, 0 }
  0x3b   : > { %s4474_s28 = scalar_lea.sflag [#allocation10], %s5599_s18 }
  0x3d   : > { %s4468_s3 = scalar_lea.hbm %s5598_s6, %s5539_s29  ;;  %s4118_s15 = scalar_lea.hbm %s5598_s6, 64 }
  0x3e   : > { %s4113_s16 = scalar_lea.hbm %s4468_s3, 32  ;;  %p4119_p6 = scmp.lt.u32.totalorder %s4468_s3, %s5598_s6 }
  0x3f   : > { %p4114_p3 = scmp.ne.s32.totalorder %s4468_s3, %s4113_s16  ;;  %p4120_p8 = scmp.lt.u32.totalorder %s4118_s15, %s4113_s16 }
  0x40   : > { %p4122_p13 = scmp.lt.u32.totalorder %s4113_s16, %s4468_s3 }
  0x41   : > { %p4116_p4 = pnand %p4114_p3, %p4430_p12  ;;  %p4121_p11 = por %p4120_p8, %p4119_p6 }
  0x43   : > { %p4117_p5 = pneg %p4116_p4  ;;  %p4123_p1 = por %p4122_p13, %p4121_p11 }
  0x45   : > { %p4124_p2 = pnand %p4123_p1, %p4117_p5 }
  0x47   : > { %4127 = shalt.err (!%p4124_p2)
}
  0x48   : > { %s4128_s27 = scalar_lea.vmem %s420_s30, 32  ;;  %s4296_s18 = smov [#allocation9]  }
  0x49   : > { %p4129_p0 = scmp.ne.s32.totalorder %s420_s30, %s4128_s27  ;;  %s4133_s23 = sshll.u32 %s4296_s18, 4  ;;  %s4134_s23 = int_to_ptr.vmem [resolvable:$false] %s4133_s23 }
  0x4a   : > { %s4135_s20 = scalar_lea.vmem %s4134_s23, 64  ;;  %p4136_p4 = scmp.lt.s32.totalorder %s420_s30, %s4134_s23 }
  0x4b   : > { %p4131_p7 = pnand %p4129_p0, %p4430_p12  ;;  %p4137_p10 = scmp.lt.s32.totalorder %s4135_s20, %s4128_s27 }
  0x4d   : > { %p4132_p3 = pneg %p4131_p7  ;;  %p4138_p9 = por %p4137_p10, %p4136_p4 }
  0x4f   : > { %p4139_p6 = pnand %p4138_p9, %p4132_p3 }
  0x51   : > { %4142 = shalt.err (!%p4139_p6)
}
  0x52   : > { %p5600_p8 = scmp.ne.s32.totalorder %s5593_s22, 0  ;;  %s5601_s11 = sshll.u32 %s4287_s13, 5 }
  0x53   : > { %s4499_s26 = scalar_lea.hbm %s5527_s2, %s5601_s11  ;;  %s5602_s23 = sshll.u32 %s4405_s21, 1 }
  0x54   : > { %4023 = dma.hbm_to_vmem [thread:$0]  (!%p5600_p8), %s4468_s3, 32, %s420_s30, %s4474_s28  }
  0x55   : > { %s346_s15 = scalar_lea.vmem [#allocation4], %s5602_s23  ;;  %s2900_s18 = sshll.u32 %s4287_s13, 4 }
  0x56   : > { %s354_s27 = sshll.u32 %s346_s15, 4  ;;  %s343_s20 = scalar_lea.sflag [#allocation5], %s4405_s21  ;;  %s4503_s27 = int_to_ptr.vmem [resolvable:$true] %s354_s27 }
  0x57   : > { %s4143_s6 = scalar_lea.hbm %s4499_s26, 32  ;;  %s4148_s11 = scalar_lea.hbm %s5527_s2, 64 }
  0x58   : > { %p4144_p9 = scmp.ne.s32.totalorder %s4499_s26, %s4143_s6  ;;  %p4149_p11 = scmp.lt.u32.totalorder %s4499_s26, %s5527_s2 }
  0x59   : > { %p4150_p13 = scmp.lt.u32.totalorder %s4148_s11, %s4143_s6  ;;  %p4152_p2 = scmp.lt.u32.totalorder %s4143_s6, %s4499_s26 }
  0x5a   : > { %p4146_p10 = pnand %p4144_p9, %p4430_p12 }
  0x5b   : > { %p4151_p1 = por %p4150_p13, %p4149_p11 }
  0x5c   : > { %p4147_p5 = pneg %p4146_p10 }
  0x5d   : > { %p4153_p0 = por %p4152_p2, %p4151_p1 }
  0x5f   : > { %p4154_p7 = pnand %p4153_p0, %p4147_p5 }
  0x61   : > { %4157 = shalt.err (!%p4154_p7)
}
  0x62   : > { %s4158_s23 = scalar_lea.vmem %s4503_s27, 32  ;;  %s4297_s15 = smov [#allocation4]  }
  0x63   : > { %p4159_p3 = scmp.ne.s32.totalorder %s4503_s27, %s4158_s23  ;;  %s4163_s3 = sshll.u32 %s4297_s15, 4  ;;  %s4164_s3 = int_to_ptr.vmem [resolvable:$false] %s4163_s3 }
  0x64   : > { %s4165_s30 = scalar_lea.vmem %s4164_s3, 64  ;;  %p4166_p9 = scmp.lt.s32.totalorder %s4503_s27, %s4164_s3 }
  0x65   : > { %p4161_p4 = pnand %p4159_p3, %p4430_p12  ;;  %p4167_p10 = scmp.lt.s32.totalorder %s4165_s30, %s4158_s23 }
  0x67   : > { %p4162_p6 = pneg %p4161_p4  ;;  %p4168_p11 = por %p4167_p10, %p4166_p9 }
  0x69   : > { %p4169_p13 = pnand %p4168_p11, %p4162_p6 }
  0x6b   : > { %4172 = shalt.err (!%p4169_p13)
}
  0x6c   : > { %4014 = dma.hbm_to_vmem [thread:$0]  (!%p5600_p8), %s4499_s26, 32, %s4503_s27, %s343_s20  }
  0x6d   : > { %s4533_s16 = scalar_lea.hbm %s5529_s4, %s2900_s18  ;;  %s385_s29 = scalar_lea.vmem [#allocation8], %s4405_s21 }
  0x6e   : > { %s392_s23 = sshll.u32 %s385_s29, 4  ;;  %s4173_s15 = scalar_lea.hbm %s4533_s16, 16  ;;  %s393_s23 = int_to_ptr.vmem [resolvable:$true] %s392_s23 }
  0x6f   : > { %p4174_p5 = scmp.ne.s32.totalorder %s4533_s16, %s4173_s15  ;;  %s4178_s27 = scalar_lea.hbm %s5529_s4, 32 }
  0x70   : > { %p4179_p0 = scmp.lt.u32.totalorder %s4533_s16, %s5529_s4  ;;  %p4180_p7 = scmp.lt.u32.totalorder %s4178_s27, %s4173_s15 }
  0x71   : > { %p4176_p1 = pnand %p4174_p5, %p4430_p12  ;;  %p4182_p4 = scmp.lt.u32.totalorder %s4173_s15, %s4533_s16 }
  0x72   : > { %p4181_p3 = por %p4180_p7, %p4179_p0 }
  0x73   : > { %p4177_p2 = pneg %p4176_p1 }
  0x74   : > { %p4183_p6 = por %p4182_p4, %p4181_p3 }
  0x76   : > { %p4184_p9 = pnand %p4183_p6, %p4177_p2 }
  0x78   : > { %4187 = shalt.err (!%p4184_p9)
}
  0x79   : > { %s4188_s6 = scalar_lea.vmem %s393_s23, 16  ;;  %s4298_s11 = smov [#allocation8]  }
  0x7a   : > { %p4189_p10 = scmp.ne.s32.totalorder %s393_s23, %s4188_s6  ;;  %s4193_s29 = sshll.u32 %s4298_s11, 4  ;;  %s4194_s29 = int_to_ptr.vmem [resolvable:$false] %s4193_s29 }
  0x7b   : > { %s4195_s3 = scalar_lea.vmem %s4194_s29, 32  ;;  %p4196_p5 = scmp.lt.s32.totalorder %s393_s23, %s4194_s29 }
  0x7c   : > { %p4191_p11 = pnand %p4189_p10, %p4430_p12  ;;  %p4197_p1 = scmp.lt.s32.totalorder %s4195_s3, %s4188_s6 }
  0x7e   : > { %p4192_p13 = pneg %p4191_p11  ;;  %p4198_p8 = por %p4197_p1, %p4196_p5 }
  0x80   : > { %p4199_p0 = pnand %p4198_p8, %p4192_p13 }
  0x82   : > { %4202 = shalt.err (!%p4199_p0)
}
  0x83   : > { %p5603_p7 = scmp.ne.s32.totalorder %s5593_s22, 0  ;;  %s4559_s27 = scalar_lea.hbm %s5533_s8, %s2900_s18 }
  0x84   : > { %s437_s20 = scalar_lea.vmem [#allocation11], %s4405_s21  ;;  %s4203_s6 = scalar_lea.hbm %s4559_s27, 16 }
  0x85   : > { %4020 = dma.hbm_to_vmem [thread:$0]  (!%p5603_p7), %s4533_s16, 16, %s393_s23, %s4424_s17  }
  0x86   : > { %s444_s30 = sshll.u32 %s437_s20, 4  ;;  %p4204_p8 = scmp.ne.s32.totalorder %s4559_s27, %s4203_s6  ;;  %s445_s30 = int_to_ptr.vmem [resolvable:$true] %s444_s30 }
  0x87   : > { %s4208_s16 = scalar_lea.hbm %s5533_s8, 32  ;;  %p4209_p4 = scmp.lt.u32.totalorder %s4559_s27, %s5533_s8 }
  0x88   : > { %p4206_p2 = pnand %p4204_p8, %p4430_p12  ;;  %p4210_p6 = scmp.lt.u32.totalorder %s4208_s16, %s4203_s6 }
  0x89   : > { %p4212_p10 = scmp.lt.u32.totalorder %s4203_s6, %s4559_s27 }
  0x8a   : > { %p4207_p3 = pneg %p4206_p2  ;;  %p4211_p9 = por %p4210_p6, %p4209_p4 }
  0x8c   : > { %p4213_p11 = por %p4212_p10, %p4211_p9 }
  0x8e   : > { %p4214_p13 = pnand %p4213_p11, %p4207_p3 }
  0x90   : > { %4217 = shalt.err (!%p4214_p13)
}
  0x91   : > { %s4218_s21 = scalar_lea.vmem %s445_s30, 16  ;;  %s4299_s18 = smov [#allocation11]  }
  0x92   : > { %p4219_p5 = scmp.ne.s32.totalorder %s445_s30, %s4218_s21  ;;  %s4223_s3 = sshll.u32 %s4299_s18, 4  ;;  %s4224_s3 = int_to_ptr.vmem [resolvable:$false] %s4223_s3 }
  0x93   : > { %s4225_s15 = scalar_lea.vmem %s4224_s3, 32  ;;  %p4226_p8 = scmp.lt.s32.totalorder %s445_s30, %s4224_s3 }
  0x94   : > { %p4221_p1 = pnand %p4219_p5, %p4430_p12  ;;  %p4227_p2 = scmp.lt.s32.totalorder %s4225_s15, %s4218_s21 }
  0x96   : > { %p4222_p0 = pneg %p4221_p1  ;;  %p4228_p7 = por %p4227_p2, %p4226_p8 }
  0x98   : > { %p4229_p4 = pnand %p4228_p7, %p4222_p0 }
  0x9a   : > { %4232 = shalt.err (!%p4229_p4)
}
  0x9b   : > { %p5604_p6 = scmp.ne.s32.totalorder %s5593_s22, 0  ;;  %p5605_p3 = scmp.ne.s32.totalorder %s5597_s25, 0 }
  0x9d   : > { %4026 = dma.hbm_to_vmem [thread:$0]  (!%p5604_p6), %s4559_s27, 16, %s445_s30, %s4474_s28  }
  0x9e   : > { %453 = sbr.rel (%p5605_p3) target bundleno = 1520 (0x5f0), region = 56 }
  0xa5   : > { %s4583_s24 = sand.u32 1, %s4275_s10   ;;  %p5606_p12 = scmp.ne.s32.totalorder %s5591_s19, 0 }
  0xa6   : > { %s2906_s26 = sshll.u32 %s4583_s24, 1  ;;  %s456_s20 = scalar_lea.sflag [#allocation5], %s4583_s24 }
  0xa7   : > { %s4587_s6 = scalar_lea.vmem [#allocation4], %s2906_s26 }
  0xa8   : > { %4258 = dma.done.wait (%p5606_p12), %s456_s20, 32  }
  0xa9   : > { %4260 = vsyncadd (%p5606_p12), %s456_s20, 4294967264  ;;  %s5607_s22 = sadd.s32 4294967295, %s4291_s14   ;;  %s3999_s28 = smul.u32 1152, %s4583_s24 }
  0xaa   : > { %s464_s25 = sand.u32 1, %s5607_s22  }
  0xab   : > { %s465_s27 = scalar_lea.sflag [#allocation7], %s464_s25  ;;  %s4596_s30 = scalar_lea.vmem [#allocation6], %s3999_s28 }
  0xac   : > { %4262 = dma.done.wait (%p5606_p12), %s465_s27, 18448  }
  0xad   : > { %4264 = vsyncadd (%p5606_p12), %s465_s27, 4294948848  ;;  %s476_s11 = scalar_lea.vmem [#allocation8], %s4583_s24  ;;  %s482_s17 = scalar_lea.sflag [#allocation10], %s464_s25 }
  0xae   : > { %s4603_s16 = scalar_lea.vmem [#allocation9], %s2906_s26 }
  0xaf   : > { %4266 = dma.done.wait (%p5606_p12), %s482_s17, 48  }
  0xb0   : > { %4268 = vsyncadd (%p5606_p12), %s482_s17, 4294967248  ;;  %p572_p7 = scmp.lt.s32.totalorder %s4283_s12, 1  ;;  %v5547_v0 = vmov 0.0   ;;  %vm626_vm0 = vcmask 1041408   ;;  %vm4301_vm1 = vmmov 1   ;;  %vm622_vm3 = vcmask 343040  }
  0xb1   : > { %700 = vmatprep.mubr.f32.mxu1 %v5547_v0  ;;  %846 = vmatprep.mubr.f32.mxu0 %v5547_v0  ;;  %vm4645_vm2 = vmpackc.low %vm626_vm0, %vm4301_vm1  ;;  %v4302_v25 = vmov 0.0|0.0   ;;  %vm4303_vm4 = vmmov 0   ;;  %v2940_v34 = vld [vmem:[%s4596_s30 + $0x188] sm:$0xff]  ;;  %v2942_v35 = vld [vmem:[%s4596_s30 + $0x198] sm:$0xff]  ;;  %s4304_s20 = smov 64   ;;  %vm1228_vm5 = vcmask 523264  }
  0xb2   : > { %s5661_s12 = smov (!%p572_p7, %s4283_s12), 1  ;;  %v2939_v36 = vld [vmem:[%s4596_s30 + $0x180] sm:$0xff]  ;;  %v4716_v37 = vpack.c.bf16 %v2942_v35, %v2940_v34  ;;  %v2941_v38 = vld [vmem:[%s4596_s30 + $0x190] sm:$0xff]  ;;  %v2944_v39 = vld [vmem:[%s4596_s30 + $0x1a8] sm:$0xff]  ;;  %vm1250_vm6 = vcmask 521216  }
  0xb3   : > { %s4000_s23 = smul.u32 144, %s5661_s12  ;;  %s3085_s19 = sshll.u32 %s5661_s12, 5  ;;  %v2946_v40 = vld [vmem:[%s4596_s30 + $0x1b8] sm:$0xff]  ;;  %v4721_v41 = vpack.c.bf16 %v2941_v38, %v2939_v36  ;;  %v2943_v43 = vld [vmem:[%s4596_s30 + $0x1a0] sm:$0xff]  ;;  %v2945_v44 = vld [vmem:[%s4596_s30 + $0x1b0] sm:$0xff] }
  0xb4   : > { %s4657_s26 = scalar_lea.vmem %s5525_s0, %s3085_s19  ;;  %v4723_v42 = vpack.c.bf16 %v2946_v40, %v2944_v39  ;;  %v2948_v45 = vld [vmem:[%s4596_s30 + $0x1c8] sm:$0xff]  ;;  %v2950_v46 = vld [vmem:[%s4596_s30 + $0x1d8] sm:$0xff]  ;;  %v4732_v47 = vpack.c.bf16 %v2945_v44, %v2943_v43  ;;  %v2947_v49 = vld [vmem:[%s4596_s30 + $0x1c0] sm:$0xff]  ;;  %s3087_s27 = sshll.u32 %s5661_s12, 8 }
  0xb5   : > { %s4619_s18 = scalar_lea.vmem %s5526_s1, %s4000_s23  ;;  %v603_v22 = vld [vmem:[%s4657_s26] sm:$0x3f]  ;;  %v2921_v23 = vld [vmem:[%s4657_s26 + $0x8] sm:$0x3f]  ;;  %v2927_v32 = vld [vmem:[%s4657_s26 + $0x10] sm:$0x3f]  ;;  %v4736_v48 = vpack.c.bf16 %v2950_v46, %v2948_v45  ;;  %s5429_s23 = scalar_lea.vmem %s5532_s7, %s3087_s27 }
  0xb6   : > { %v605_v1 = vld [vmem:[%s4619_s18 + $0x8] sm:$0xff]  ;;  %v608_v2 = vld [vmem:[%s4619_s18 + $0x20] sm:$0xff]  ;;  %v607_v5 = vld [vmem:[%s4619_s18 + $0x18] sm:$0xff]  ;;  %s2915_s29 = sshll.u32 %s5661_s12, 1 }
  0xb7   : > { %v604_v3 = vld [vmem:[%s4619_s18] sm:$0xff]  ;;  %v4624_v4 = vpack.c.bf16 %v608_v2, %v605_v1  ;;  %v611_v6 = vld [vmem:[%s4619_s18 + $0x38] sm:$0xff]  ;;  %v614_v7 = vld [vmem:[%s4619_s18 + $0x50] sm:$0xff] }
  0xb8   : > { %v4629_v8 = vpack.c.bf16 %v607_v5, %v604_v3  ;;  %v4631_v9 = vpack.c.bf16 %v614_v7, %v611_v6  ;;  %v610_v10 = vld [vmem:[%s4619_s18 + $0x30] sm:$0xff]  ;;  %v613_v11 = vld [vmem:[%s4619_s18 + $0x48] sm:$0xff]  ;;  %v620_v13 = vld [vmem:[%s4619_s18 + $0x80] sm:$0x3] }
  0xb9   : > { %v617_v12 = vld [vmem:[%s4619_s18 + $0x68] sm:$0xff]  ;;  %3212 = vmatprep.subr.bf16.mxu1 %v4624_v4  ;;  %3236 = vmatprep.subr.bf16.mxu0 %v4624_v4  ;;  %v3217_v14 = vpack.c.bf16 %v613_v11, %v610_v10  ;;  %v616_v16 = vld [vmem:[%s4619_s18 + $0x60] sm:$0xff]  ;;  %v619_v17 = vld [vmem:[%s4619_s18 + $0x78] sm:$0x3] }
  0xba   : > { %3214 = vmatpush1.bf16.msra.mxu1 %v4629_v8  ;;  %3238 = vmatpush1.bf16.msra.mxu0 %v4629_v8  ;;  %v3219_v15 = vpack.c.bf16 %v620_v13, %v617_v12  ;;  %v3222_v19 = vpack.c.bf16 %v619_v17, %v616_v16  ;;  %v606_v20 = vld [vmem:[%s4619_s18 + $0x10] sm:$0xff]  ;;  %v609_v21 = vld [vmem:[%s4619_s18 + $0x28] sm:$0xff]  ;;  %v612_v26 = vld [vmem:[%s4619_s18 + $0x40] sm:$0xff] }
  0xbb   : > { %3216 = vmatprep.subr.bf16.mxu1 %v4631_v9  ;;  %3240 = vmatprep.subr.bf16.mxu0 %v4631_v9  ;;  %v3226_v24 = vpack.c.bf16 %v609_v21, %v606_v20  ;;  %v615_v27 = vld [vmem:[%s4619_s18 + $0x58] sm:$0xff]  ;;  %v618_v29 = vld [vmem:[%s4619_s18 + $0x70] sm:$0xff]  ;;  %v621_v30 = vld [vmem:[%s4619_s18 + $0x88] sm:$0x3]  ;;  %s602_s18 = scalar_lea.vmem %s5534_s9, %s2915_s29 }
  0xbc   : > { %v3229_v28 = vpack.c.bf16 %v615_v27, %v612_v26  ;;  %v3232_v31 = vpack.c.bf16 %v621_v30, %v618_v29  ;;  %v2933_v33 = vld [vmem:[%s4657_s26 + $0x18] sm:$0x3f]  ;;  %v2952_v52 = vld [vmem:[%s4596_s30 + $0x1e8] sm:$0xff]  ;;  %v2951_v54 = vld [vmem:[%s4596_s30 + $0x1e0] sm:$0xff] }
  0xbd   : > { %v2949_v50 = vld [vmem:[%s4596_s30 + $0x1d0] sm:$0xff]  ;;  %v2954_v53 = vld [vmem:[%s4596_s30 + $0x1f8] sm:$0xff]  ;;  %v2956_v57 = vld [vmem:[%s4596_s30 + $0x208] sm:$0xff] }
  0xbe   : > { %3218 = vmatpush1.bf16.msra.mxu1 %v3217_v14  ;;  %3242 = vmatpush1.bf16.msra.mxu0 %v3217_v14  ;;  %v4745_v51 = vpack.c.bf16 %v2949_v50, %v2947_v49  ;;  %v4751_v55 = vpack.c.bf16 %v2954_v53, %v2952_v52  ;;  %v2953_v56 = vld [vmem:[%s4596_s30 + $0x1f0] sm:$0xff]  ;;  %v2958_v58 = vld [vmem:[%s4596_s30 + $0x218] sm:$0xff]  ;;  %v2955_v61 = vld [vmem:[%s4596_s30 + $0x200] sm:$0xff] }
  0xbf   : > { %3221 = vmatprep.subr.msk.bf16.mxu1 %vm4645_vm2, %v3219_v15  ;;  %3245 = vmatprep.subr.msk.bf16.mxu0 %vm4645_vm2, %v3219_v15  ;;  %v4757_v59 = vpack.c.bf16 %v2953_v56, %v2951_v54  ;;  %v4759_v60 = vpack.c.bf16 %v2958_v58, %v2956_v57  ;;  %v2957_v62 = vld [vmem:[%s4596_s30 + $0x210] sm:$0xff]  ;;  %v2960_v63 = vld [vmem:[%s4596_s30 + $0x228] sm:$0xff]  ;;  %v2962_v1 = vld [vmem:[%s4596_s30 + $0x238] sm:$0xff] }
  0xc0   : > { %v4768_v2 = vpack.c.bf16 %v2957_v62, %v2955_v61  ;;  %v4772_v3 = vpack.c.bf16 %v2962_v1, %v2960_v63  ;;  %v2961_v5 = vld [vmem:[%s4596_s30 + $0x230] sm:$0xff]  ;;  %v2964_v6 = vld [vmem:[%s4596_s30 + $0x248] sm:$0xff]  ;;  %v2966_v7 = vld [vmem:[%s4596_s30 + $0x258] sm:$0xff] }
  0xc1   : > { %v4788_v11 = vpack.c.bf16 %v2966_v7, %v2964_v6  ;;  %v2963_v12 = vld [vmem:[%s4596_s30 + $0x240] sm:$0xff]  ;;  %v2965_v13 = vld [vmem:[%s4596_s30 + $0x250] sm:$0xff]  ;;  %v2968_v17 = vld [vmem:[%s4596_s30 + $0x268] sm:$0xff] }
  0xc2   : > { %3224 = vmatpush1.bf16.msk.msra.mxu1 %vm4645_vm2, %v3222_v19  ;;  %3248 = vmatpush1.bf16.msk.msra.mxu0 %vm4645_vm2, %v3222_v19  ;;  %v2970_v18 = vld [vmem:[%s4596_s30 + $0x278] sm:$0xff]  ;;  %v4800_v20 = vpack.c.bf16 %v2965_v13, %v2963_v12  ;;  %v2971_v30 = vld [vmem:[%s4596_s30 + $0x280] sm:$0xff]  ;;  %v2976_v35 = vld [vmem:[%s4596_s30 + $0x2a8] sm:$0xff] }
  0xc3   : > { %3225 = vmatprep.subr.bf16.mxu1 %v4302_v25  ;;  %3260 = vmatprep.subr.bf16.mxu0 %v4624_v4  ;;  %v4806_v21 = vpack.c.bf16 %v2970_v18, %v2968_v17  ;;  %v2974_v26 = vld [vmem:[%s4596_s30 + $0x298] sm:$0xff]  ;;  %v2975_v39 = vld [vmem:[%s4596_s30 + $0x2a0] sm:$0xff]  ;;  %v2977_v40 = vld [vmem:[%s4596_s30 + $0x2b0] sm:$0xff] }
  0xc4   : > { %v2978_v36 = vld [vmem:[%s4596_s30 + $0x2b8] sm:$0xff]  ;;  %v4839_v43 = vpack.c.bf16 %v2977_v40, %v2975_v39  ;;  %v2980_v44 = vld [vmem:[%s4596_s30 + $0x2c8] sm:$0xff]  ;;  %v2979_v49 = vld [vmem:[%s4596_s30 + $0x2c0] sm:$0xff] }
  0xc5   : > { %2918 = vmatmul.mubr.msk.f32.vlgmr.msra.gmra.mrb[0].mxu1 %vm622_vm3, %v603_v22  ;;  %2924 = vmatmul.mubr.msk.f32.vlgmr.msra.gmra.mrb[0].mxu0 %vm622_vm3, %v2921_v23  ;;  %v4835_v38 = vpack.c.bf16 %v2978_v36, %v2976_v35  ;;  %v2982_v45 = vld [vmem:[%s4596_s30 + $0x2d8] sm:$0xff]  ;;  %v2981_v50 = vld [vmem:[%s4596_s30 + $0x2d0] sm:$0xff]  ;;  %v2984_v53 = vld [vmem:[%s4596_s30 + $0x2e8] sm:$0xff] }
  0xc6   : > { %3227 = vmatpush3.bf16.msra.mxu1 %v3226_v24  ;;  %3262 = vmatpush1.bf16.msra.mxu0 %v4629_v8  ;;  %v4847_v46 = vpack.c.bf16 %v2982_v45, %v2980_v44  ;;  %v4851_v52 = vpack.c.bf16 %v2981_v50, %v2979_v49  ;;  %v2986_v54 = vld [vmem:[%s4596_s30 + $0x2f8] sm:$0xff]  ;;  %v2983_v56 = vld [vmem:[%s4596_s30 + $0x2e0] sm:$0xff]  ;;  %v2985_v58 = vld [vmem:[%s4596_s30 + $0x2f0] sm:$0xff] }
  0xc7   : > { %3228 = vmatprep.subr.bf16.mxu1 %v4302_v25  ;;  %3163 = vmatprep.mubr.msk.f32.mxu1 %vm4303_vm4, %v5547_v0  ;;  %v4857_v57 = vpack.c.bf16 %v2986_v54, %v2984_v53  ;;  %v4862_v61 = vpack.c.bf16 %v2985_v58, %v2983_v56  ;;  %v1273_v12 = vld [vmem:[%s4596_s30 + $0x8] sm:$0xff]  ;;  %v1275_v13 = vld [vmem:[%s4596_s30 + $0x18] sm:$0xff]  ;;  %v1272_v54 = vld [vmem:[%s4596_s30] sm:$0xff] }
  0xc8   : > { %3264 = vmatprep.subr.bf16.mxu0 %v4631_v9  ;;  %992 = vmatprep.mubr.f32.mxu0 %v5547_v0  ;;  %v1274_v56 = vld [vmem:[%s4596_s30 + $0x10] sm:$0xff]  ;;  %v1277_v58 = vld [vmem:[%s4596_s30 + $0x28] sm:$0xff] }
  0xca   : > { %3230 = vmatpush3.bf16.msra.mxu1 %v3229_v28  ;;  %3266 = vmatpush1.bf16.msra.mxu0 %v3217_v14 }
  0xcb   : > { %3231 = vmatprep.subr.bf16.mxu1 %v4302_v25  ;;  %3269 = vmatprep.subr.msk.bf16.mxu0 %vm4645_vm2, %v3219_v15 }
  0xce   : > { %3234 = vmatpush3.bf16.msk.msra.mxu1 %vm4645_vm2, %v3232_v31  ;;  %3272 = vmatpush1.bf16.msk.msra.mxu0 %vm4645_vm2, %v3222_v19 }
  0xcf   : > { %3249 = vmatprep.subr.bf16.mxu1 %v4302_v25  ;;  %3284 = vmatprep.subr.bf16.mxu0 %v4624_v4  ;;  %v2959_v4 = vld [vmem:[%s4596_s30 + $0x220] sm:$0xff] }
  0xd1   : > { %3164 = vmatmul.mubr.msk.f32.vlgmr.msra.gmra.mrb[2].mxu1 %vm622_vm3, %v603_v22  ;;  %2930 = vmatmul.mubr.msk.f32.vlgmr.msra.gmra.mrb[2].mxu0 %vm622_vm3, %v2927_v32  ;;  %v2967_v22 = vld [vmem:[%s4596_s30 + $0x260] sm:$0xff] }
  0xd2   : > { %3251 = vmatpush3.bf16.msra.mxu1 %v3226_v24  ;;  %3286 = vmatpush1.bf16.msra.mxu0 %v4629_v8  ;;  %v4780_v8 = vpack.c.bf16 %v2961_v5, %v2959_v4 }
  0xd3   : > { %3252 = vmatprep.subr.bf16.mxu1 %v4302_v25  ;;  %3178 = vmatprep.mubr.msk.f32.mxu1 %vm4303_vm4, %v5547_v0 }
  0xd4   : > { %3288 = vmatprep.subr.bf16.mxu0 %v4631_v9  ;;  %1138 = vmatprep.mubr.f32.mxu0 %v5547_v0 }
  0xd6   : > { %3254 = vmatpush3.bf16.msra.mxu1 %v3229_v28  ;;  %3290 = vmatpush1.bf16.msra.mxu0 %v3217_v14 }
  0xd7   : > { %3255 = vmatprep.subr.bf16.mxu1 %v4302_v25  ;;  %3293 = vmatprep.subr.msk.bf16.mxu0 %vm4645_vm2, %v3219_v15 }
  0xda   : > { %3258 = vmatpush3.bf16.msk.msra.mxu1 %vm4645_vm2, %v3232_v31  ;;  %3296 = vmatpush1.bf16.msk.msra.mxu0 %vm4645_vm2, %v3222_v19 }
  0xdb   : > { %3273 = vmatprep.subr.bf16.mxu1 %v4302_v25  ;;  %3308 = vmatprep.subr.bf16.mxu0 %v4716_v37 }
  0xdd   : > { %3179 = vmatmul.mubr.msk.f32.vlgmr.msra.gmra.mrb[4].mxu1 %vm622_vm3, %v2921_v23  ;;  %2936 = vmatmul.mubr.msk.f32.vlgmr.msra.gmra.mrb[4].mxu0 %vm622_vm3, %v2933_v33  ;;  %v2969_v23 = vld [vmem:[%s4596_s30 + $0x270] sm:$0xff] }
  0xde   : > { %3275 = vmatpush3.bf16.msra.mxu1 %v3226_v24  ;;  %3193 = vmatprep.mubr.msk.f32.mxu1 %vm4303_vm4, %v5547_v0 }
  0xdf   : > { %3276 = vmatprep.subr.bf16.mxu1 %v4302_v25  ;;  %3310 = vmatpush1.bf16.msra.mxu0 %v4721_v41 }
  0xe0   : > { %3312 = vmatprep.subr.bf16.mxu0 %v4723_v42 }
  0xe2   : > { %3278 = vmatpush3.bf16.msra.mxu1 %v3229_v28 }
  0xe3   : > { %3279 = vmatprep.subr.bf16.mxu1 %v4302_v25  ;;  %3314 = vmatpush1.bf16.msra.mxu0 %v4732_v47 }
  0xe4   : > { %3316 = vmatprep.subr.bf16.mxu0 %v4736_v48 }
  0xe6   : > { %3282 = vmatpush3.bf16.msk.msra.mxu1 %vm4645_vm2, %v3232_v31 }
  0xe7   : > { %3297 = vmatprep.subr.bf16.mxu1 %v4302_v25  ;;  %3318 = vmatpush1.bf16.msra.mxu0 %v4745_v51 }
  0xe8   : > { %3320 = vmatprep.subr.bf16.mxu0 %v4751_v55 }
  0xe9   : > { %3194 = vmatmul.mubr.msk.f32.vlgmr.msra.gmra.mrb[6].mxu1 %vm622_vm3, %v2927_v32 }
  0xea   : > { %3299 = vmatpush3.bf16.msra.mxu1 %v3226_v24  ;;  %3208 = vmatprep.mubr.msk.f32.mxu1 %vm4303_vm4, %v5547_v0  ;;  %v4812_v24 = vpack.c.bf16 %v2969_v23, %v2967_v22  ;;  %v2998_v0 = vld [vmem:[%s4596_s30 + $0x348] sm:$0xff] }
  0xeb   : > { %3300 = vmatprep.subr.bf16.mxu1 %v4302_v25  ;;  %3322 = vmatpush1.bf16.msra.mxu0 %v4757_v59 }
  0xec   : > { %3324 = vmatprep.subr.bf16.mxu0 %v4759_v60 }
  0xee   : > { %3302 = vmatpush3.bf16.msra.mxu1 %v3229_v28 }
  0xef   : > { %3303 = vmatprep.subr.bf16.mxu1 %v4302_v25  ;;  %3326 = vmatpush1.bf16.msra.mxu0 %v4768_v2  ;;  %v2972_v25 = vld [vmem:[%s4596_s30 + $0x288] sm:$0xff] }
  0xf0   : > { %3328 = vmatprep.subr.bf16.mxu0 %v4772_v3  ;;  %v4823_v29 = vpack.c.bf16 %v2974_v26, %v2972_v25  ;;  %v1235_v25 = vlaneseq }
  0xf2   : > { %3306 = vmatpush3.bf16.msk.msra.mxu1 %vm4645_vm2, %v3232_v31  ;;  %v2973_v31 = vld [vmem:[%s4596_s30 + $0x290] sm:$0xff]  ;;  %v4885_v26 = vshrl.u32 %v1235_v25, 7 }
  0xf3   : > { %3452 = vmatprep.subr.bf16.mxu1 %v4716_v37  ;;  %3330 = vmatpush1.bf16.msra.mxu0 %v4780_v8  ;;  %v4827_v34 = vpack.c.bf16 %v2973_v31, %v2971_v30  ;;  %v1221_v31 = vld [vmem:[%s4587_s6] sm:$0x3]  ;;  %v1282_v25 = vld [vmem:[%s4596_s30 + $0x50] sm:$0xff]  ;;  %s3086_s6 = sshll.u32 %s5661_s12, 9 }
  0xf4   : > { %3332 = vmatprep.subr.bf16.mxu0 %v4788_v11  ;;  %5610 = vst [vmem:[#allocation18_spill] sm:$0xff] %v4885_v26  ;;  %s5379_s28 = scalar_lea.vmem %s5530_s5, %s3086_s6 }
  0xf5   : > { %3209 = vmatmul.mubr.msk.f32.vlgmr.msra.gmra.mrb[8].mxu1 %vm622_vm3, %v2933_v33 }
  0xf6   : > { %3454 = vmatpush1.bf16.msra.mxu1 %v4721_v41 }
  0xf7   : > { %3456 = vmatprep.subr.bf16.mxu1 %v4723_v42  ;;  %3334 = vmatpush1.bf16.msra.mxu0 %v4800_v20 }
  0xf8   : > { %3336 = vmatprep.subr.bf16.mxu0 %v4806_v21 }
  0xfa   : > { %3458 = vmatpush1.bf16.msra.mxu1 %v4732_v47 }
  0xfb   : > { %3460 = vmatprep.subr.bf16.mxu1 %v4736_v48  ;;  %3338 = vmatpush1.bf16.msra.mxu0 %v4812_v24 }
  0xfc   : > { %3340 = vmatprep.subr.bf16.mxu0 %v4823_v29 }
  0xfe   : > { %3462 = vmatpush1.bf16.msra.mxu1 %v4745_v51 }
  0xff   : > { %3464 = vmatprep.subr.bf16.mxu1 %v4751_v55  ;;  %3342 = vmatpush1.bf16.msra.mxu0 %v4827_v34 }
 0x100   : > { %3344 = vmatprep.subr.bf16.mxu0 %v4835_v38 }
 0x102   : > { %3466 = vmatpush1.bf16.msra.mxu1 %v4757_v59 }
 0x103   : > { %3468 = vmatprep.subr.bf16.mxu1 %v4759_v60  ;;  %3346 = vmatpush1.bf16.msra.mxu0 %v4839_v43 }
 0x104   : > { %3348 = vmatprep.subr.bf16.mxu0 %v4847_v46 }
 0x106   : > { %3470 = vmatpush1.bf16.msra.mxu1 %v4768_v2 }
 0x107   : > { %3472 = vmatprep.subr.bf16.mxu1 %v4772_v3  ;;  %3350 = vmatpush1.bf16.msra.mxu0 %v4851_v52 }
 0x108   : > { %3352 = vmatprep.subr.bf16.mxu0 %v4857_v57 }
 0x10a   : > { %3474 = vmatpush1.bf16.msra.mxu1 %v4780_v8 }
 0x10b   : > { %3476 = vmatprep.subr.bf16.mxu1 %v4788_v11  ;;  %3354 = vmatpush1.bf16.msra.mxu0 %v4862_v61 }
 0x10e   : > { %3478 = vmatpush1.bf16.msra.mxu1 %v4800_v20 }
 0x10f   : > { %3480 = vmatprep.subr.bf16.mxu1 %v4806_v21 }
 0x112   : > { %3482 = vmatpush1.bf16.msra.mxu1 %v4812_v24 }
 0x113   : > { %3484 = vmatprep.subr.bf16.mxu1 %v4823_v29 }
 0x116   : > { %3486 = vmatpush1.bf16.msra.mxu1 %v4827_v34 }
 0x117   : > { %3488 = vmatprep.subr.bf16.mxu1 %v4835_v38 }
 0x11a   : > { %3490 = vmatpush1.bf16.msra.mxu1 %v4839_v43 }
 0x11b   : > { %3492 = vmatprep.subr.bf16.mxu1 %v4847_v46 }
 0x11e   : > { %3494 = vmatpush1.bf16.msra.mxu1 %v4851_v52 }
 0x11f   : > { %3496 = vmatprep.subr.bf16.mxu1 %v4857_v57 }
 0x122   : > { %3498 = vmatpush1.bf16.msra.mxu1 %v4862_v61 }
 0x198   : > { %v4783_v9 = vpop.f32.mrb[0].mxu1  ;;  %v4785_v10 = vpop.f32.mrb[0].mxu0 }
 0x199   : > { %v1215_v14 = vmax.f32 %v4783_v9, %v4785_v10  ;;  %v704_v15 = vpop.f32.mrb[1].mxu1  ;;  %v850_v16 = vpop.f32.mrb[1].mxu0  ;;  %v4906_v10 = vpack.c.bf16 %v1274_v56, %v1272_v54  ;;  %v1291_v54 = vld [vmem:[%s4596_s30 + $0x98] sm:$0xff] }
 0x19a   : > { %v4797_v19 = vmax.f32 %v704_v15, %v850_v16  ;;  %v4879_v15 = vpack.c.bf16 %v1275_v13, %v1273_v12  ;;  %v1278_v12 = vld [vmem:[%s4596_s30 + $0x30] sm:$0xff]  ;;  %v1281_v13 = vld [vmem:[%s4596_s30 + $0x48] sm:$0xff] }
 0x19c   : > { %1224 = vrot.lane.b32.xlu0 %v4797_v19, %s4304_s20  ;;  %3500 = vmatprep.subr.bf16.mxu1 %v4879_v15 }
 0x19d   : > { %3356 = vmatprep.subr.bf16.mxu0 %v4879_v15 }
 0x1a4   : > { %v773_v27 = vpop.f32.mrb[2].mxu1  ;;  %v4821_v28 = vpop.f32.mrb[2].mxu0 }
 0x1a5   : > { %v3165_v32 = vpop.f32.mrb[3].mxu1  ;;  %v996_v33 = vpop.f32.mrb[3].mxu0 }
 0x1a6   : > { %v5546_v32 = vsub.s32 0, %v4885_v26 }
 0x1a8   : > { %v1238_v35 = vrot.slane %v1221_v31, %v5546_v32 }
 0x1b0   : > { %v919_v62 = vpop.f32.mrb[4].mxu1  ;;  %v4865_v63 = vpop.f32.mrb[4].mxu0 }
 0x1b1   : > { %v1217_v1 = vmax.f32 %v773_v27, %v919_v62  ;;  %v3180_v4 = vpop.f32.mrb[5].mxu1  ;;  %v1218_v5 = vmax.f32 %v4821_v28, %v4865_v63  ;;  %v1142_v6 = vpop.f32.mrb[5].mxu0  ;;  %v5545_v27 = vsub.s32 1, %v4885_v26  ;;  %v1295_v28 = vld [vmem:[%s4596_s30 + $0xb8] sm:$0xff] }
 0x1b2   : > { %v4871_v7 = vmax.f32 %v996_v33, %v1142_v6  ;;  %v1276_v6 = vld [vmem:[%s4596_s30 + $0x20] sm:$0xff]  ;;  %v3000_v26 = vld [vmem:[%s4596_s30 + $0x358] sm:$0xff] }
 0x1b3   : > { %1226 = vrot.lane.b32.xlu0 %v1217_v1, %s4304_s20  ;;  %v1242_v33 = vrot.slane %v1221_v31, %v5545_v27  ;;  %v1287_v31 = vld [vmem:[%s4596_s30 + $0x78] sm:$0xff] }
 0x1b4   : > { %1254 = vrot.lane.b32.xlu1 %v4871_v7, %s4304_s20 }
 0x1bc   : > { %v1065_v16 = vpop.f32.mrb[6].mxu1 }
 0x1bd   : > { %v3195_v17 = vpop.f32.mrb[7].mxu1 }
 0x1be   : > { %v4920_v17 = vpack.c.bf16 %v1278_v12, %v1276_v6  ;;  %v1288_v6 = vld [vmem:[%s4596_s30 + $0x80] sm:$0xff] }
 0x1c8   : > { %v1211_v18 = vpop.f32.mrb[8].mxu1 }
 0x1c9   : > { %v1220_v22 = vmax.f32 %v1065_v16, %v1211_v18  ;;  %v3210_v23 = vpop.f32.mrb[9].mxu1  ;;  %v1283_v16 = vld [vmem:[%s4596_s30 + $0x58] sm:$0xff] }
 0x1ca   : > { %v1280_v23 = vld [vmem:[%s4596_s30 + $0x40] sm:$0xff] }
 0x1cb   : > { %1256 = vrot.lane.b32.xlu1 %v1220_v22, %s4304_s20  ;;  %v4923_v22 = vpack.c.bf16 %v1283_v16, %v1281_v13  ;;  %v1293_v13 = vld [vmem:[%s4596_s30 + $0xa8] sm:$0xff]  ;;  %v1294_v16 = vld [vmem:[%s4596_s30 + $0xb0] sm:$0xff] }
 0x20e   : > { %v1225_v30 = vpop.permute.xlu0 %1224 }
 0x225   : > { %v1227_v36 = vpop.permute.xlu0 %1226 }
 0x226   : > { %v1229_v39 = vsel %vm1228_vm5, %v1225_v30, %v1227_v36  ;;  %v1233_v40 = vmax.f32 %v4797_v19, %v1227_v36  ;;  %v1279_v19 = vld [vmem:[%s4596_s30 + $0x38] sm:$0xff]  ;;  %v1255_v18 = vpop.permute.xlu1 %1254  ;;  %v1285_v30 = vld [vmem:[%s4596_s30 + $0x68] sm:$0xff]  ;;  %v4930_v36 = vpack.c.bf16 %v1282_v25, %v1280_v23 }
 0x227   : > { %v1232_v44 = vmax.f32 %v1215_v14, %v1229_v39  ;;  %v4910_v4 = vpack.c.bf16 %v1279_v19, %v1277_v58  ;;  %v1297_v23 = vld [vmem:[%s4596_s30 + $0xc8] sm:$0xff]  ;;  %v1299_v25 = vld [vmem:[%s4596_s30 + $0xd8] sm:$0xff] }
 0x228   : > { %v1246_v45 = vadd.f32 %v1242_v33, %v1233_v40  ;;  %v4933_v40 = vpack.c.bf16 %v1287_v31, %v1285_v30  ;;  %v1296_v30 = vld [vmem:[%s4596_s30 + $0xc0] sm:$0xff]  ;;  %v1298_v31 = vld [vmem:[%s4596_s30 + $0xd0] sm:$0xff] }
 0x229   : > { %v1245_v49 = vadd.f32 %v1238_v35, %v1232_v44  ;;  %v1284_v44 = vld [vmem:[%s4596_s30 + $0x60] sm:$0xff] }
 0x22a   : > { %v1248_v50 = vmax.f32 %v1246_v45, 0.0  ;;  %v1286_v45 = vld [vmem:[%s4596_s30 + $0x70] sm:$0xff] }
 0x22b   : > { %v1247_v53 = vmax.f32 %v1245_v49, 0.0  ;;  %v4945_v19 = vpack.c.bf16 %v1286_v45, %v1284_v44  ;;  %v1303_v44 = vld [vmem:[%s4596_s30 + $0xf8] sm:$0xff] }
 0x22c   : > { %1251 = vst.msk [vmem:[#allocation2 + $0x8] sm:$0x3f] %vm1250_vm6, %v1248_v50 }
 0x22d   : > { %1249 = vst [vmem:[#allocation2] sm:$0x3f] %v1247_v53  ;;  %v1289_v53 = vld [vmem:[%s4596_s30 + $0x88] sm:$0xff] }
 0x233   : > { %v1520_v62 = vld [vmem:[#allocation2 + $0x8] sm:$0xc] }
 0x234   : > { %v4904_v1 = vrot.slane %v1520_v62, 2  ;;  %v1519_v9 = vld [vmem:[#allocation2] sm:$0xc] }
 0x235   : > { %v4908_v14 = vrot.slane %v1519_v9, 2  ;;  %v4948_v9 = vpack.c.bf16 %v1291_v54, %v1289_v53  ;;  %v4979_v53 = vpack.c.bf16 %v1298_v31, %v1296_v30  ;;  %v1271_v54 = vld [vmem:[#allocation2 + $0x8] sm:$0x3]  ;;  %v1310_v31 = vld [vmem:[%s4596_s30 + $0x130] sm:$0xff] }
 0x236   : > { %3038 = vmatprep.mubr.msk.f32.mxu1 %vm1228_vm5, %v4904_v1  ;;  %v1308_v30 = vld [vmem:[%s4596_s30 + $0x120] sm:$0xff] }
 0x237   : > { %1715 = vmatmul.mubr.f32.vlgmr.msra.gmra.mrb[10].mxu1 %v4908_v14  ;;  %5611 = vst [vmem:[#allocation19_spill] sm:$0xff] %v4979_v53 }
 0x238   : > { %3502 = vmatpush1.bf16.msra.mxu1 %v4906_v10 }
 0x239   : > { %3504 = vmatprep.subr.bf16.mxu1 %v4910_v4 }
 0x23c   : > { %3506 = vmatpush1.bf16.msra.mxu1 %v4920_v17 }
 0x23d   : > { %v1257_v39 = vpop.permute.xlu1 %1256  ;;  %3508 = vmatprep.subr.bf16.mxu1 %v4923_v22 }
 0x23e   : > { %v1258_v49 = vsel %vm1228_vm5, %v1255_v18, %v1257_v39  ;;  %v1262_v50 = vmax.f32 %v4871_v7, %v1257_v39  ;;  %v1290_v7 = vld [vmem:[%s4596_s30 + $0x90] sm:$0xff]  ;;  %v1301_v39 = vld [vmem:[%s4596_s30 + $0xe8] sm:$0xff] }
 0x23f   : > { %v1261_v56 = vmax.f32 %v1218_v5, %v1258_v49  ;;  %v4956_v5 = vpack.c.bf16 %v1290_v7, %v1288_v6  ;;  %v4973_v49 = vpack.c.bf16 %v1299_v25, %v1297_v23  ;;  %v1305_v6 = vld [vmem:[%s4596_s30 + $0x108] sm:$0xff]  ;;  %v1307_v7 = vld [vmem:[%s4596_s30 + $0x118] sm:$0xff] }
 0x240   : > { %v1264_v58 = vadd.f32 %v1262_v50, %v1242_v33  ;;  %3510 = vmatpush1.bf16.msra.mxu1 %v4930_v36  ;;  %v4959_v33 = vpack.c.bf16 %v1295_v28, %v1293_v13  ;;  %v4997_v13 = vpack.c.bf16 %v1307_v7, %v1305_v6  ;;  %v1304_v28 = vld [vmem:[%s4596_s30 + $0x100] sm:$0xff]  ;;  %v1317_v6 = vld [vmem:[%s4596_s30 + $0x168] sm:$0xff]  ;;  %v1319_v7 = vld [vmem:[%s4596_s30 + $0x178] sm:$0xff] }
 0x241   : > { %v1263_v62 = vadd.f32 %v1261_v56, %v1238_v35  ;;  %3512 = vmatprep.subr.bf16.mxu1 %v4933_v40  ;;  %v1292_v35 = vld [vmem:[%s4596_s30 + $0xa0] sm:$0xff]  ;;  %v4983_v56 = vpack.c.bf16 %v1303_v44, %v1301_v39  ;;  %v1313_v39 = vld [vmem:[%s4596_s30 + $0x148] sm:$0xff]  ;;  %v1315_v44 = vld [vmem:[%s4596_s30 + $0x158] sm:$0xff] }
 0x242   : > { %v1266_v12 = vmax.f32 %v1264_v58, 0.0  ;;  %v4964_v18 = vpack.c.bf16 %v1294_v16, %v1292_v35  ;;  %v1300_v58 = vld [vmem:[%s4596_s30 + $0xe0] sm:$0xff]  ;;  %5614 = vst [vmem:[#allocation22_spill] sm:$0xff] %v4997_v13  ;;  %v1309_v35 = vld [vmem:[%s4596_s30 + $0x128] sm:$0xff]  ;;  %v1311_v16 = vld [vmem:[%s4596_s30 + $0x138] sm:$0xff] }
 0x243   : > { %v1265_v63 = vmax.f32 %v1263_v62, 0.0  ;;  %5612 = vst [vmem:[#allocation20_spill] sm:$0xff] %v4983_v56  ;;  %v1302_v62 = vld [vmem:[%s4596_s30 + $0xf0] sm:$0xff]  ;;  %v5009_v25 = vpack.c.bf16 %v1311_v16, %v1309_v35  ;;  %v1316_v35 = vld [vmem:[%s4596_s30 + $0x160] sm:$0xff] }
 0x244   : > { %1268 = vst.msk [vmem:[#allocation3 + $0x8] sm:$0x3f] %vm1250_vm6, %v1266_v12  ;;  %3514 = vmatpush1.bf16.msra.mxu1 %v4945_v19  ;;  %v4994_v12 = vpack.c.bf16 %v1302_v62, %v1300_v58  ;;  %v1312_v58 = vld [vmem:[%s4596_s30 + $0x140] sm:$0xff]  ;;  %v1314_v62 = vld [vmem:[%s4596_s30 + $0x150] sm:$0xff] }
 0x245   : > { %1267 = vst [vmem:[#allocation3] sm:$0x3f] %v1265_v63  ;;  %3516 = vmatprep.subr.bf16.mxu1 %v4948_v9  ;;  %v1306_v63 = vld [vmem:[%s4596_s30 + $0x110] sm:$0xff]  ;;  %5616 = vst [vmem:[#allocation24_spill] sm:$0xff] %v5009_v25 }
 0x246   : > { %5613 = vst [vmem:[#allocation21_spill] sm:$0xff] %v4994_v12  ;;  %v5006_v23 = vpack.c.bf16 %v1306_v63, %v1304_v28  ;;  %v5030_v28 = vpack.c.bf16 %v1314_v62, %v1312_v58  ;;  %v5033_v63 = vpack.c.bf16 %v1319_v7, %v1317_v6  ;;  %v1318_v16 = vld [vmem:[%s4596_s30 + $0x170] sm:$0xff]  ;;  %v2989_v58 = vld [vmem:[%s4596_s30 + $0x300] sm:$0xff]  ;;  %v2994_v6 = vld [vmem:[%s4596_s30 + $0x328] sm:$0xff] }
 0x247   : > { %v2991_v62 = vld [vmem:[%s4596_s30 + $0x310] sm:$0xff]  ;;  %v2996_v7 = vld [vmem:[%s4596_s30 + $0x338] sm:$0xff] }
 0x248   : > { %3518 = vmatpush1.bf16.msra.mxu1 %v4956_v5  ;;  %5615 = vst [vmem:[#allocation23_spill] sm:$0xff] %v5006_v23  ;;  %5619 = vst [vmem:[#allocation27_spill] sm:$0xff] %v5030_v28  ;;  %v5054_v32 = vpack.c.bf16 %v2991_v62, %v2989_v58  ;;  %v2997_v62 = vld [vmem:[%s4596_s30 + $0x340] sm:$0xff] }
 0x249   : > { %3520 = vmatprep.subr.bf16.mxu1 %v4959_v33  ;;  %5620 = vst [vmem:[#allocation28_spill] sm:$0xff] %v5033_v63 }
 0x24a   : > { %5623 = vst [vmem:[#allocation31_spill] sm:$0xff] %v5054_v32 }
 0x24b   : > { %v1321_v45 = vld [vmem:[#allocation3 + $0x8] sm:$0x3]  ;;  %v1793_v27 = vld [vmem:[#allocation3 + $0x8] sm:$0xc] }
 0x24c   : > { %3522 = vmatpush1.bf16.msra.mxu1 %v4964_v18  ;;  %2987 = vmatprep.mubr.msk.f32.mxu0 %vm1228_vm5, %v1321_v45  ;;  %v4977_v50 = vld [vmem:[#allocation3] sm:$0x3] }
 0x24d   : > { %3039 = vmatprep.mubr.msk.f32.mxu1 %vm1228_vm5, %v1321_v45  ;;  %1439 = vmatmul.mubr.f32.vlgmr.msra.gmra.mrb[6].mxu0 %v4977_v50  ;;  %v5018_v45 = vpack.c.bf16 %v1310_v31, %v1308_v30  ;;  %v2990_v30 = vld [vmem:[%s4596_s30 + $0x308] sm:$0xff]  ;;  %v2992_v31 = vld [vmem:[%s4596_s30 + $0x318] sm:$0xff] }
 0x24e   : > { %3358 = vmatpush1.bf16.msra.mxu0 %v4906_v10  ;;  %2988 = vmatprep.mubr.msk.f32.mxu0 %vm1228_vm5, %v1271_v54  ;;  %v5021_v54 = vpack.c.bf16 %v1315_v44, %v1313_v39  ;;  %v5042_v39 = vpack.c.bf16 %v1318_v16, %v1316_v35  ;;  %v5045_v44 = vpack.c.bf16 %v2992_v31, %v2990_v30  ;;  %v2993_v16 = vld [vmem:[%s4596_s30 + $0x320] sm:$0xff]  ;;  %v2995_v30 = vld [vmem:[%s4596_s30 + $0x330] sm:$0xff]  ;;  %v5062_v31 = vrot.slane %v1793_v27, 2 }
 0x24f   : > { %3524 = vmatprep.subr.bf16.mxu1 %v4973_v49  ;;  %3360 = vmatprep.subr.bf16.mxu0 %v4910_v4  ;;  %5617 = vst [vmem:[#allocation25_spill] sm:$0xff] %v5018_v45  ;;  %v5057_v35 = vpack.c.bf16 %v2996_v7, %v2994_v6  ;;  %v5071_v58 = vpack.c.bf16 %v2995_v30, %v2993_v16  ;;  %v2999_v6 = vld [vmem:[%s4596_s30 + $0x350] sm:$0xff]  ;;  %v3004_v7 = vld [vmem:[%s4596_s30 + $0x378] sm:$0xff] }
 0x250   : > { %3526 = vmatpush1.bf16.msra.mxu1 %v4979_v53  ;;  %5618 = vst [vmem:[#allocation26_spill] sm:$0xff] %v5021_v54  ;;  %5621 = vst [vmem:[#allocation29_spill] sm:$0xff] %v5042_v39  ;;  %v5074_v27 = vpack.c.bf16 %v3000_v26, %v2998_v0  ;;  %v5083_v16 = vpack.c.bf16 %v2999_v6, %v2997_v62  ;;  %v3001_v26 = vld [vmem:[%s4596_s30 + $0x360] sm:$0xff]  ;;  %v3003_v30 = vld [vmem:[%s4596_s30 + $0x370] sm:$0xff] }
 0x251   : > { %3528 = vmatprep.subr.bf16.mxu1 %v4983_v56  ;;  %5622 = vst [vmem:[#allocation30_spill] sm:$0xff] %v5045_v44  ;;  %5624 = vst [vmem:[#allocation32_spill] sm:$0xff] %v5057_v35  ;;  %v5095_v62 = vpack.c.bf16 %v3003_v30, %v3001_v26  ;;  %v3011_v30 = vld [vmem:[%s4596_s30 + $0x3b0] sm:$0xff] }
 0x252   : > { %3362 = vmatpush1.bf16.msra.mxu0 %v4920_v17  ;;  %5625 = vst [vmem:[#allocation33_spill] sm:$0xff] %v5071_v58  ;;  %5626 = vst [vmem:[#allocation34_spill] sm:$0xff] %v5074_v27 }
 0x253   : > { %3364 = vmatprep.subr.bf16.mxu0 %v4923_v22  ;;  %5627 = vst [vmem:[#allocation35_spill] sm:$0xff] %v5083_v16 }
 0x254   : > { %3530 = vmatpush1.bf16.msra.mxu1 %v4994_v12 }
 0x255   : > { %3532 = vmatprep.subr.bf16.mxu1 %v4997_v13 }
 0x256   : > { %3366 = vmatpush1.bf16.msra.mxu0 %v4930_v36 }
 0x257   : > { %3368 = vmatprep.subr.bf16.mxu0 %v4933_v40 }
 0x258   : > { %3534 = vmatpush1.bf16.msra.mxu1 %v5006_v23 }
 0x259   : > { %3536 = vmatprep.subr.bf16.mxu1 %v5009_v25 }
 0x25a   : > { %3370 = vmatpush1.bf16.msra.mxu0 %v4945_v19 }
 0x25b   : > { %3372 = vmatprep.subr.bf16.mxu0 %v4948_v9 }
 0x25c   : > { %3538 = vmatpush1.bf16.msra.mxu1 %v5018_v45 }
 0x25d   : > { %3540 = vmatprep.subr.bf16.mxu1 %v5021_v54 }
 0x25e   : > { %3374 = vmatpush1.bf16.msra.mxu0 %v4956_v5 }
 0x25f   : > { %3376 = vmatprep.subr.bf16.mxu0 %v4959_v33 }
 0x260   : > { %3542 = vmatpush1.bf16.msra.mxu1 %v5030_v28 }
 0x261   : > { %3544 = vmatprep.subr.bf16.mxu1 %v5033_v63 }
 0x262   : > { %3378 = vmatpush1.bf16.msra.mxu0 %v4964_v18 }
 0x263   : > { %3380 = vmatprep.subr.bf16.mxu0 %v4973_v49 }
 0x264   : > { %3546 = vmatpush1.bf16.msra.mxu1 %v5042_v39 }
 0x265   : > { %3548 = vmatprep.subr.bf16.mxu1 %v5045_v44 }
 0x266   : > { %3382 = vmatpush1.bf16.msra.mxu0 %v4979_v53  ;;  %v3035_v53 = vld [vmem:[%s4596_s30 + $0x470] sm:$0xff] }
 0x267   : > { %1786 = vmatmul.mubr.f32.vlgmr.msra.gmra.mrb[10].mxu1 %v4977_v50  ;;  %3384 = vmatprep.subr.bf16.mxu0 %v4983_v56  ;;  %v3002_v50 = vld [vmem:[%s4596_s30 + $0x368] sm:$0xff]  ;;  %v3008_v56 = vld [vmem:[%s4596_s30 + $0x398] sm:$0xff] }
 0x268   : > { %3550 = vmatpush1.bf16.msra.mxu1 %v5054_v32  ;;  %3040 = vmatprep.mubr.msk.f32.mxu1 %vm1228_vm5, %v5062_v31  ;;  %v5086_v0 = vpack.c.bf16 %v3004_v7, %v3002_v50  ;;  %v3005_v50 = vld [vmem:[%s4596_s30 + $0x380] sm:$0xff]  ;;  %v3007_v7 = vld [vmem:[%s4596_s30 + $0x390] sm:$0xff] }
 0x269   : > { %3552 = vmatprep.subr.bf16.mxu1 %v5057_v35  ;;  %v5107_v26 = vpack.c.bf16 %v3007_v7, %v3005_v50  ;;  %v3018_v7 = vld [vmem:[%s4596_s30 + $0x3e8] sm:$0xff] }
 0x26a   : > { %3386 = vmatpush1.bf16.msra.mxu0 %v4994_v12  ;;  %5628 = vst [vmem:[#allocation36_spill] sm:$0xff] %v5086_v0  ;;  %v3006_v12 = vld [vmem:[%s4596_s30 + $0x388] sm:$0xff] }
 0x26b   : > { %3388 = vmatprep.subr.bf16.mxu0 %v4997_v13  ;;  %v5098_v6 = vpack.c.bf16 %v3008_v56, %v3006_v12  ;;  %v3012_v13 = vld [vmem:[%s4596_s30 + $0x3b8] sm:$0xff]  ;;  %v3009_v12 = vld [vmem:[%s4596_s30 + $0x3a0] sm:$0xff] }
 0x26c   : > { %3554 = vmatpush1.bf16.msra.mxu1 %v5071_v58 }
 0x26d   : > { %3556 = vmatprep.subr.bf16.mxu1 %v5074_v27 }
 0x26e   : > { %3390 = vmatpush1.bf16.msra.mxu0 %v5006_v23  ;;  %v3010_v23 = vld [vmem:[%s4596_s30 + $0x3a8] sm:$0xff] }
 0x26f   : > { %3392 = vmatprep.subr.bf16.mxu0 %v5009_v25  ;;  %v5110_v56 = vpack.c.bf16 %v3012_v13, %v3010_v23  ;;  %v3016_v25 = vld [vmem:[%s4596_s30 + $0x3d8] sm:$0xff]  ;;  %v3013_v13 = vld [vmem:[%s4596_s30 + $0x3c0] sm:$0xff]  ;;  %v3015_v23 = vld [vmem:[%s4596_s30 + $0x3d0] sm:$0xff] }
 0x270   : > { %3558 = vmatpush1.bf16.msra.mxu1 %v5083_v16 }
 0x271   : > { %3560 = vmatprep.subr.bf16.mxu1 %v5086_v0 }
 0x272   : > { %3394 = vmatpush1.bf16.msra.mxu0 %v5018_v45  ;;  %v3014_v45 = vld [vmem:[%s4596_s30 + $0x3c8] sm:$0xff] }
 0x273   : > { %3396 = vmatprep.subr.bf16.mxu0 %v5021_v54  ;;  %v5119_v54 = vpack.c.bf16 %v3011_v30, %v3009_v12  ;;  %v5122_v50 = vpack.c.bf16 %v3016_v25, %v3014_v45  ;;  %v5131_v12 = vpack.c.bf16 %v3015_v23, %v3013_v13  ;;  %v3017_v45 = vld [vmem:[%s4596_s30 + $0x3e0] sm:$0xff]  ;;  %v3019_v30 = vld [vmem:[%s4596_s30 + $0x3f0] sm:$0xff] }
 0x274   : > { %3562 = vmatpush1.bf16.msra.mxu1 %v5095_v62  ;;  %v3021_v13 = vld [vmem:[%s4596_s30 + $0x400] sm:$0xff]  ;;  %v3023_v23 = vld [vmem:[%s4596_s30 + $0x410] sm:$0xff] }
 0x275   : > { %3564 = vmatprep.subr.bf16.mxu1 %v5098_v6 }
 0x276   : > { %3398 = vmatpush1.bf16.msra.mxu0 %v5030_v28  ;;  %v3020_v28 = vld [vmem:[%s4596_s30 + $0x3f8] sm:$0xff] }
 0x277   : > { %3400 = vmatprep.subr.bf16.mxu0 %v5033_v63  ;;  %v1270_v63 = vld [vmem:[#allocation2] sm:$0x3]  ;;  %v5134_v25 = vpack.c.bf16 %v3020_v28, %v3018_v7  ;;  %v3026_v7 = vld [vmem:[%s4596_s30 + $0x428] sm:$0xff] }
 0x278   : > { %3566 = vmatpush1.bf16.msra.mxu1 %v5107_v26 }
 0x279   : > { %3568 = vmatprep.subr.bf16.mxu1 %v5110_v56 }
 0x27a   : > { %3402 = vmatpush1.bf16.msra.mxu0 %v5042_v39  ;;  %v3024_v39 = vld [vmem:[%s4596_s30 + $0x418] sm:$0xff] }
 0x27b   : > { %3404 = vmatprep.subr.bf16.mxu0 %v5045_v44  ;;  %v3022_v44 = vld [vmem:[%s4596_s30 + $0x408] sm:$0xff] }
 0x27c   : > { %3570 = vmatpush1.bf16.msra.mxu1 %v5119_v54  ;;  %v5148_v28 = vpack.c.bf16 %v3024_v39, %v3022_v44  ;;  %v3025_v44 = vld [vmem:[%s4596_s30 + $0x420] sm:$0xff] }
 0x27d   : > { %1513 = vmatmul.mubr.f32.vlgmr.msra.gmra.mrb[6].mxu0 %v1270_v63  ;;  %3572 = vmatprep.subr.bf16.mxu1 %v5122_v50  ;;  %v5145_v63 = vpack.c.bf16 %v3019_v30, %v3017_v45  ;;  %v5157_v45 = vpack.c.bf16 %v3023_v23, %v3021_v13  ;;  %v3027_v30 = vld [vmem:[%s4596_s30 + $0x430] sm:$0xff] }
 0x27e   : > { %3406 = vmatpush1.bf16.msra.mxu0 %v5054_v32  ;;  %3037 = vmatprep.mubr.msk.f32.mxu0 %vm1228_vm5, %v4904_v1  ;;  %v3028_v32 = vld [vmem:[%s4596_s30 + $0x438] sm:$0xff]  ;;  %v5169_v13 = vpack.c.bf16 %v3027_v30, %v3025_v44  ;;  %v3033_v30 = vld [vmem:[%s4596_s30 + $0x460] sm:$0xff] }
 0x27f   : > { %3408 = vmatprep.subr.bf16.mxu0 %v5057_v35  ;;  %v5160_v39 = vpack.c.bf16 %v3028_v32, %v3026_v7  ;;  %v3032_v35 = vld [vmem:[%s4596_s30 + $0x458] sm:$0xff]  ;;  %v3029_v32 = vld [vmem:[%s4596_s30 + $0x440] sm:$0xff]  ;;  %v3031_v7 = vld [vmem:[%s4596_s30 + $0x450] sm:$0xff] }
 0x280   : > { %3574 = vmatpush1.bf16.msra.mxu1 %v5131_v12 }
 0x281   : > { %3576 = vmatprep.subr.bf16.mxu1 %v5134_v25 }
 0x282   : > { %3410 = vmatpush1.bf16.msra.mxu0 %v5071_v58  ;;  %v3030_v58 = vld [vmem:[%s4596_s30 + $0x448] sm:$0xff] }
 0x283   : > { %3412 = vmatprep.subr.bf16.mxu0 %v5074_v27  ;;  %v5172_v23 = vpack.c.bf16 %v3032_v35, %v3030_v58  ;;  %v3034_v27 = vld [vmem:[%s4596_s30 + $0x468] sm:$0xff]  ;;  %v5191_v35 = vpack.c.bf16 %v3035_v53, %v3033_v30  ;;  %v3064_v30 = vld [vmem:[%s5379_s28 + $0x180] sm:$0xff] }
 0x284   : > { %3578 = vmatpush1.bf16.msra.mxu1 %v5145_v63  ;;  %v1792_v58 = vld [vmem:[#allocation3] sm:$0xc] }
 0x285   : > { %3580 = vmatprep.subr.bf16.mxu1 %v5148_v28 }
 0x286   : > { %3414 = vmatpush1.bf16.msra.mxu0 %v5083_v16  ;;  %v3036_v16 = vld [vmem:[%s4596_s30 + $0x478] sm:$0xff] }
 0x287   : > { %3416 = vmatprep.subr.bf16.mxu0 %v5086_v0  ;;  %v5181_v0 = vpack.c.bf16 %v3031_v7, %v3029_v32  ;;  %v5184_v44 = vpack.c.bf16 %v3036_v16, %v3034_v27  ;;  %v5196_v32 = vld [vmem:[#allocation2 + $0x8] sm:$0x30]  ;;  %v5199_v27 = vrot.slane %v1792_v58, 2  ;;  %v3056_v16 = vld [vmem:[%s5379_s28 + $0x140] sm:$0xff] }
 0x288   : > { %3582 = vmatpush1.bf16.msra.mxu1 %v5157_v45  ;;  %v2023_v53 = vrot.slane %v5196_v32, 4  ;;  %v3069_v32 = vld [vmem:[%s5379_s28 + $0x1a8] sm:$0xff] }
 0x289   : > { %3584 = vmatprep.subr.bf16.mxu1 %v5160_v39 }
 0x28a   : > { %3418 = vmatpush1.bf16.msra.mxu0 %v5095_v62 }
 0x28b   : > { %3420 = vmatprep.subr.bf16.mxu0 %v5098_v6 }
 0x28c   : > { %3586 = vmatpush1.bf16.msra.mxu1 %v5169_v13 }
 0x28d   : > { %3588 = vmatprep.subr.bf16.mxu1 %v5172_v23 }
 0x28e   : > { %3422 = vmatpush1.bf16.msra.mxu0 %v5107_v26 }
 0x28f   : > { %3424 = vmatprep.subr.bf16.mxu0 %v5110_v56 }
 0x290   : > { %3590 = vmatpush1.bf16.msra.mxu1 %v5181_v0 }
 0x291   : > { %3592 = vmatprep.subr.bf16.mxu1 %v5184_v44 }
 0x292   : > { %3426 = vmatpush1.bf16.msra.mxu0 %v5119_v54 }
 0x293   : > { %3428 = vmatprep.subr.bf16.mxu0 %v5122_v50 }
 0x294   : > { %3594 = vmatpush1.bf16.msra.mxu1 %v5191_v35 }
 0x295   : > { %3740 = vmatprep.subr.bf16.mxu1 %v4716_v37 }
 0x296   : > { %3430 = vmatpush1.bf16.msra.mxu0 %v5131_v12 }
 0x297   : > { %1866 = vmatmul.mubr.f32.vlgmr.msra.gmra.mrb[10].mxu1 %v5199_v27  ;;  %3432 = vmatprep.subr.bf16.mxu0 %v5134_v25 }
 0x298   : > { %3742 = vmatpush1.bf16.msra.mxu1 %v4721_v41  ;;  %3044 = vmatprep.mubr.msk.f32.mxu1 %vm1228_vm5, %v2023_v53 }
 0x299   : > { %3744 = vmatprep.subr.bf16.mxu1 %v4723_v42 }
 0x29a   : > { %3434 = vmatpush1.bf16.msra.mxu0 %v5145_v63 }
 0x29b   : > { %3436 = vmatprep.subr.bf16.mxu0 %v5148_v28 }
 0x29c   : > { %3746 = vmatpush1.bf16.msra.mxu1 %v4732_v47 }
 0x29d   : > { %3748 = vmatprep.subr.bf16.mxu1 %v4736_v48 }
 0x29e   : > { %3438 = vmatpush1.bf16.msra.mxu0 %v5157_v45 }
 0x29f   : > { %3440 = vmatprep.subr.bf16.mxu0 %v5160_v39 }
 0x2a0   : > { %3750 = vmatpush1.bf16.msra.mxu1 %v4745_v51 }
 0x2a1   : > { %3752 = vmatprep.subr.bf16.mxu1 %v4751_v55 }
 0x2a2   : > { %3442 = vmatpush1.bf16.msra.mxu0 %v5169_v13 }
 0x2a3   : > { %3444 = vmatprep.subr.bf16.mxu0 %v5172_v23 }
 0x2a4   : > { %3754 = vmatpush1.bf16.msra.mxu1 %v4757_v59 }
 0x2a5   : > { %3756 = vmatprep.subr.bf16.mxu1 %v4759_v60 }
 0x2a6   : > { %3446 = vmatpush1.bf16.msra.mxu0 %v5181_v0 }
 0x2a7   : > { %3448 = vmatprep.subr.bf16.mxu0 %v5184_v44 }
 0x2a8   : > { %3758 = vmatpush1.bf16.msra.mxu1 %v4768_v2 }
 0x2a9   : > { %3760 = vmatprep.subr.bf16.mxu1 %v4772_v3 }
 0x2aa   : > { %3450 = vmatpush1.bf16.msra.mxu0 %v5191_v35 }
 0x2ab   : > { %3596 = vmatprep.subr.bf16.mxu0 %v4716_v37  ;;  %v5255_v37 = vld [vmem:[#allocation2] sm:$0x30] }
 0x2ac   : > { %3762 = vmatpush1.bf16.msra.mxu1 %v4780_v8 }
 0x2ad   : > { %1642 = vmatmul.mubr.f32.vlgmr.msra.gmra.mrb[6].mxu0 %v4908_v14  ;;  %3764 = vmatprep.subr.bf16.mxu1 %v4788_v11 }
 0x2ae   : > { %3598 = vmatpush1.bf16.msra.mxu0 %v4721_v41  ;;  %3041 = vmatprep.mubr.msk.f32.mxu0 %vm1228_vm5, %v5062_v31  ;;  %v2022_v41 = vrot.slane %v5255_v37, 4 }
 0x2af   : > { %3600 = vmatprep.subr.bf16.mxu0 %v4723_v42  ;;  %v5629_v42 = vld [vmem:[#allocation19_spill] sm:$0xff] }
 0x2b0   : > { %3766 = vmatpush1.bf16.msra.mxu1 %v4800_v20 }
 0x2b1   : > { %3768 = vmatprep.subr.bf16.mxu1 %v4806_v21 }
 0x2b2   : > { %3602 = vmatpush1.bf16.msra.mxu0 %v4732_v47  ;;  %v5630_v47 = vld [vmem:[#allocation20_spill] sm:$0xff] }
 0x2b3   : > { %3604 = vmatprep.subr.bf16.mxu0 %v4736_v48  ;;  %v5631_v48 = vld [vmem:[#allocation21_spill] sm:$0xff] }
 0x2b4   : > { %3770 = vmatpush1.bf16.msra.mxu1 %v4812_v24 }
 0x2b5   : > { %3772 = vmatprep.subr.bf16.mxu1 %v4823_v29 }
 0x2b6   : > { %3606 = vmatpush1.bf16.msra.mxu0 %v4745_v51  ;;  %v5632_v51 = vld [vmem:[#allocation22_spill] sm:$0xff] }
 0x2b7   : > { %3608 = vmatprep.subr.bf16.mxu0 %v4751_v55  ;;  %v5633_v55 = vld [vmem:[#allocation23_spill] sm:$0xff] }
 0x2b8   : > { %3774 = vmatpush1.bf16.msra.mxu1 %v4827_v34 }
 0x2b9   : > { %3776 = vmatprep.subr.bf16.mxu1 %v4835_v38 }
 0x2ba   : > { %3610 = vmatpush1.bf16.msra.mxu0 %v4757_v59  ;;  %v5634_v59 = vld [vmem:[#allocation24_spill] sm:$0xff] }
 0x2bb   : > { %3612 = vmatprep.subr.bf16.mxu0 %v4759_v60  ;;  %v5635_v60 = vld [vmem:[#allocation25_spill] sm:$0xff] }
 0x2bc   : > { %3778 = vmatpush1.bf16.msra.mxu1 %v4839_v43 }
 0x2bd   : > { %3780 = vmatprep.subr.bf16.mxu1 %v4847_v46 }
 0x2be   : > { %3614 = vmatpush1.bf16.msra.mxu0 %v4768_v2  ;;  %v5636_v2 = vld [vmem:[#allocation26_spill] sm:$0xff] }
 0x2bf   : > { %3616 = vmatprep.subr.bf16.mxu0 %v4772_v3  ;;  %v5637_v3 = vld [vmem:[#allocation27_spill] sm:$0xff] }
 0x2c0   : > { %3782 = vmatpush1.bf16.msra.mxu1 %v4851_v52 }
 0x2c1   : > { %3784 = vmatprep.subr.bf16.mxu1 %v4857_v57 }
 0x2c2   : > { %3618 = vmatpush1.bf16.msra.mxu0 %v4780_v8  ;;  %v5638_v8 = vld [vmem:[#allocation28_spill] sm:$0xff] }
 0x2c3   : > { %3620 = vmatprep.subr.bf16.mxu0 %v4788_v11  ;;  %v2243_v11 = vld [vmem:[#allocation3 + $0x8] sm:$0x30] }
 0x2c4   : > { %3786 = vmatpush1.bf16.msra.mxu1 %v4862_v61 }
 0x2c5   : > { %3788 = vmatprep.subr.bf16.mxu1 %v4879_v15 }
 0x2c6   : > { %3622 = vmatpush1.bf16.msra.mxu0 %v4800_v20  ;;  %v5639_v20 = vld [vmem:[#allocation29_spill] sm:$0xff] }
 0x2c7   : > { %2165 = vmatmul.mubr.f32.vlgmr.msra.gmra.mrb[12].mxu1 %v2022_v41  ;;  %3624 = vmatprep.subr.bf16.mxu0 %v4806_v21  ;;  %v5640_v21 = vld [vmem:[#allocation30_spill] sm:$0xff] }
 0x2c8   : > { %3790 = vmatpush1.bf16.msra.mxu1 %v4906_v10  ;;  %3045 = vmatprep.mubr.msk.f32.mxu1 %vm1228_vm5, %v5062_v31  ;;  %v3059_v31 = vld [vmem:[%s5379_s28 + $0x158] sm:$0xff] }
 0x2c9   : > { %3792 = vmatprep.subr.bf16.mxu1 %v4910_v4 }
 0x2ca   : > { %3626 = vmatpush1.bf16.msra.mxu0 %v4812_v24  ;;  %v2247_v24 = vrot.slane %v2243_v11, 4 }
 0x2cb   : > { %3628 = vmatprep.subr.bf16.mxu0 %v4823_v29  ;;  %v5641_v29 = vld [vmem:[#allocation31_spill] sm:$0xff] }
 0x2cc   : > { %3794 = vmatpush1.bf16.msra.mxu1 %v4920_v17 }
 0x2cd   : > { %3796 = vmatprep.subr.bf16.mxu1 %v4923_v22 }
 0x2ce   : > { %3630 = vmatpush1.bf16.msra.mxu0 %v4827_v34  ;;  %v5642_v34 = vld [vmem:[#allocation32_spill] sm:$0xff] }
 0x2cf   : > { %3632 = vmatprep.subr.bf16.mxu0 %v4835_v38  ;;  %v5643_v38 = vld [vmem:[#allocation33_spill] sm:$0xff] }
 0x2d0   : > { %3798 = vmatpush1.bf16.msra.mxu1 %v4930_v36 }
 0x2d1   : > { %3800 = vmatprep.subr.bf16.mxu1 %v4933_v40 }
 0x2d2   : > { %3634 = vmatpush1.bf16.msra.mxu0 %v4839_v43  ;;  %v5644_v43 = vld [vmem:[#allocation34_spill] sm:$0xff] }
 0x2d3   : > { %3636 = vmatprep.subr.bf16.mxu0 %v4847_v46  ;;  %v5645_v46 = vld [vmem:[#allocation35_spill] sm:$0xff] }
 0x2d4   : > { %3802 = vmatpush1.bf16.msra.mxu1 %v4945_v19 }
 0x2d5   : > { %3804 = vmatprep.subr.bf16.mxu1 %v4948_v9 }
 0x2d6   : > { %3638 = vmatpush1.bf16.msra.mxu0 %v4851_v52  ;;  %v5646_v52 = vld [vmem:[#allocation36_spill] sm:$0xff] }
 0x2d7   : > { %3640 = vmatprep.subr.bf16.mxu0 %v4857_v57  ;;  %v2242_v57 = vld [vmem:[#allocation3] sm:$0x30] }
 0x2d8   : > { %3806 = vmatpush1.bf16.msra.mxu1 %v4956_v5 }
 0x2d9   : > { %3808 = vmatprep.subr.bf16.mxu1 %v4959_v33 }
 0x2da   : > { %3642 = vmatpush1.bf16.msra.mxu0 %v4862_v61  ;;  %v2246_v61 = vrot.slane %v2242_v57, 4 }
 0x2db   : > { %3644 = vmatprep.subr.bf16.mxu0 %v4879_v15  ;;  %v3049_v15 = vld [vmem:[%s5379_s28 + $0x108] sm:$0xff] }
 0x2dc   : > { %3810 = vmatpush1.bf16.msra.mxu1 %v4964_v18 }
 0x2dd   : > { %1941 = vmatmul.mubr.f32.vlgmr.msra.gmra.mrb[8].mxu0 %v5199_v27  ;;  %3812 = vmatprep.subr.bf16.mxu1 %v4973_v49 }
 0x2de   : > { %3646 = vmatpush1.bf16.msra.mxu0 %v4906_v10  ;;  %3042 = vmatprep.mubr.msk.f32.mxu0 %vm1228_vm5, %v4904_v1  ;;  %v3051_v1 = vld [vmem:[%s5379_s28 + $0x118] sm:$0xff] }
 0x2df   : > { %3648 = vmatprep.subr.bf16.mxu0 %v4910_v4  ;;  %v3883_v10 = vpack.c.bf16 %v3051_v1, %v3049_v15  ;;  %v2579_v15 = vld [vmem:[%s5429_s23 + $0x90] sm:$0xff]  ;;  %v2580_v1 = vld [vmem:[%s5429_s23 + $0x98] sm:$0xff] }
 0x2e0   : > { %3814 = vmatpush1.bf16.msra.mxu1 %v5629_v42 }
 0x2e1   : > { %3816 = vmatprep.subr.bf16.mxu1 %v5630_v47 }
 0x2e2   : > { %3650 = vmatpush1.bf16.msra.mxu0 %v4920_v17 }
 0x2e3   : > { %3652 = vmatprep.subr.bf16.mxu0 %v4923_v22  ;;  %v3048_v22 = vld [vmem:[%s5379_s28 + $0x100] sm:$0xff] }
 0x2e4   : > { %3818 = vmatpush1.bf16.msra.mxu1 %v5631_v48 }
 0x2e5   : > { %3820 = vmatprep.subr.bf16.mxu1 %v5632_v51 }
 0x2e6   : > { %3654 = vmatpush1.bf16.msra.mxu0 %v4930_v36  ;;  %v3050_v36 = vld [vmem:[%s5379_s28 + $0x110] sm:$0xff] }
 0x2e7   : > { %3656 = vmatprep.subr.bf16.mxu0 %v4933_v40  ;;  %v3885_v40 = vpack.c.bf16 %v3050_v36, %v3048_v22  ;;  %v2564_v22 = vld [vmem:[%s5429_s23 + $0x18] sm:$0xff]  ;;  %v2581_v36 = vld [vmem:[%s5429_s23 + $0xa0] sm:$0xff] }
 0x2e8   : > { %3822 = vmatpush1.bf16.msra.mxu1 %v5633_v55 }
 0x2e9   : > { %3824 = vmatprep.subr.bf16.mxu1 %v5634_v59 }
 0x2ea   : > { %3658 = vmatpush1.bf16.msra.mxu0 %v4945_v19  ;;  %v3053_v19 = vld [vmem:[%s5379_s28 + $0x128] sm:$0xff] }
 0x2eb   : > { %3660 = vmatprep.subr.bf16.mxu0 %v4948_v9  ;;  %v3055_v9 = vld [vmem:[%s5379_s28 + $0x138] sm:$0xff] }
 0x2ec   : > { %3826 = vmatpush1.bf16.msra.mxu1 %v5635_v60 }
 0x2ed   : > { %3828 = vmatprep.subr.bf16.mxu1 %v5636_v2 }
 0x2ee   : > { %3662 = vmatpush1.bf16.msra.mxu0 %v4956_v5  ;;  %v3887_v5 = vpack.c.bf16 %v3055_v9, %v3053_v19 }
 0x2ef   : > { %3664 = vmatprep.subr.bf16.mxu0 %v4959_v33  ;;  %v3052_v33 = vld [vmem:[%s5379_s28 + $0x120] sm:$0xff] }
 0x2f0   : > { %3830 = vmatpush1.bf16.msra.mxu1 %v5637_v3 }
 0x2f1   : > { %3832 = vmatprep.subr.bf16.mxu1 %v5638_v8 }
 0x2f2   : > { %3666 = vmatpush1.bf16.msra.mxu0 %v4964_v18  ;;  %v3054_v18 = vld [vmem:[%s5379_s28 + $0x130] sm:$0xff] }
 0x2f3   : > { %3668 = vmatprep.subr.bf16.mxu0 %v4973_v49  ;;  %v3057_v49 = vld [vmem:[%s5379_s28 + $0x148] sm:$0xff] }
 0x2f4   : > { %3834 = vmatpush1.bf16.msra.mxu1 %v5639_v20 }
 0x2f5   : > { %3836 = vmatprep.subr.bf16.mxu1 %v5640_v21 }
 0x2f6   : > { %3670 = vmatpush1.bf16.msra.mxu0 %v5629_v42  ;;  %v3070_v42 = vld [vmem:[%s5379_s28 + $0x1b0] sm:$0xff] }
 0x2f7   : > { %2236 = vmatmul.mubr.f32.vlgmr.msra.gmra.mrb[12].mxu1 %v5199_v27  ;;  %3672 = vmatprep.subr.bf16.mxu0 %v5630_v47  ;;  %v3071_v27 = vld [vmem:[%s5379_s28 + $0x1b8] sm:$0xff] }
 0x2f8   : > { %3838 = vmatpush1.bf16.msra.mxu1 %v5641_v29  ;;  %3046 = vmatprep.mubr.msk.f32.mxu1 %vm1228_vm5, %v2247_v24  ;;  %v3903_v37 = vpack.c.bf16 %v3071_v27, %v3069_v32 }
 0x2f9   : > { %3840 = vmatprep.subr.bf16.mxu1 %v5642_v34 }
 0x2fa   : > { %3674 = vmatpush1.bf16.msra.mxu0 %v5631_v48  ;;  %v3073_v48 = vld [vmem:[%s5379_s28 + $0x1c8] sm:$0xff] }
 0x2fb   : > { %3676 = vmatprep.subr.bf16.mxu0 %v5632_v51  ;;  %v3075_v51 = vld [vmem:[%s5379_s28 + $0x1d8] sm:$0xff] }
 0x2fc   : > { %3842 = vmatpush1.bf16.msra.mxu1 %v5643_v38 }
 0x2fd   : > { %3844 = vmatprep.subr.bf16.mxu1 %v5644_v43 }
 0x2fe   : > { %3678 = vmatpush1.bf16.msra.mxu0 %v5633_v55  ;;  %v3907_v55 = vpack.c.bf16 %v3075_v51, %v3073_v48  ;;  %v2340_v48 = vld [vmem:[%s5379_s28 + $0x10] sm:$0xff]  ;;  %v3047_v51 = vld [vmem:[%s476_s11] ss:$0 sm:$0xff]  ;;  %s493_s11 = scalar_lea.vmem [#allocation11], %s4583_s24 }
 0x2ff   : > { %3680 = vmatprep.subr.bf16.mxu0 %v5634_v59  ;;  %v3072_v59 = vld [vmem:[%s5379_s28 + $0x1c0] sm:$0xff] }
 0x300   : > { %3846 = vmatpush1.bf16.msra.mxu1 %v5645_v46 }
 0x301   : > { %3848 = vmatprep.subr.bf16.mxu1 %v5646_v52 }
 0x302   : > { %3682 = vmatpush1.bf16.msra.mxu0 %v5635_v60  ;;  %v3074_v60 = vld [vmem:[%s5379_s28 + $0x1d0] sm:$0xff] }
 0x303   : > { %3684 = vmatprep.subr.bf16.mxu0 %v5636_v2  ;;  %v3909_v2 = vpack.c.bf16 %v3074_v60, %v3072_v59  ;;  %v2345_v59 = vld [vmem:[%s5379_s28 + $0x38] sm:$0xff] }
 0x304   : > { %3850 = vmatpush1.bf16.msra.mxu1 %v5095_v62 }
 0x305   : > { %3852 = vmatprep.subr.bf16.mxu1 %v5098_v6 }
 0x306   : > { %3686 = vmatpush1.bf16.msra.mxu0 %v5637_v3  ;;  %v3077_v3 = vld [vmem:[%s5379_s28 + $0x1e8] sm:$0xff] }
 0x307   : > { %3688 = vmatprep.subr.bf16.mxu0 %v5638_v8  ;;  %v3079_v8 = vld [vmem:[%s5379_s28 + $0x1f8] sm:$0xff] }
 0x308   : > { %3854 = vmatpush1.bf16.msra.mxu1 %v5107_v26  ;;  %v3911_v11 = vpack.c.bf16 %v3079_v8, %v3077_v3 }
 0x309   : > { %3856 = vmatprep.subr.bf16.mxu1 %v5110_v56 }
 0x30a   : > { %3690 = vmatpush1.bf16.msra.mxu0 %v5639_v20  ;;  %v3076_v20 = vld [vmem:[%s5379_s28 + $0x1e0] sm:$0xff] }
 0x30b   : > { %3692 = vmatprep.subr.bf16.mxu0 %v5640_v21  ;;  %v3078_v21 = vld [vmem:[%s5379_s28 + $0x1f0] sm:$0xff] }
 0x30c   : > { %3858 = vmatpush1.bf16.msra.mxu1 %v5119_v54  ;;  %v3913_v24 = vpack.c.bf16 %v3078_v21, %v3076_v20  ;;  %v2344_v20 = vld [vmem:[%s5379_s28 + $0x30] sm:$0xff]  ;;  %v2347_v21 = vld [vmem:[%s5379_s28 + $0x48] sm:$0xff] }
 0x30d   : > { %2012 = vmatmul.mubr.f32.vlgmr.msra.gmra.mrb[8].mxu0 %v4908_v14  ;;  %3860 = vmatprep.subr.bf16.mxu1 %v5122_v50  ;;  %v5647_v14 = vmov 0.0  }
 0x30e   : > { %3694 = vmatpush1.bf16.msra.mxu0 %v5641_v29  ;;  %3043 = vmatprep.mubr.msk.f32.mxu0 %vm1228_vm5, %v2023_v53  ;;  %v2339_v29 = vld [vmem:[%s5379_s28 + $0x8] sm:$0xff] }
 0x30f   : > { %3696 = vmatprep.subr.bf16.mxu0 %v5642_v34  ;;  %v2341_v34 = vld [vmem:[%s5379_s28 + $0x18] sm:$0xff] }
 0x310   : > { %3862 = vmatpush1.bf16.msra.mxu1 %v5131_v12 }
 0x311   : > { %3864 = vmatprep.subr.bf16.mxu1 %v5134_v25 }
 0x312   : > { %3698 = vmatpush1.bf16.msra.mxu0 %v5643_v38  ;;  %v3915_v38 = vpack.c.bf16 %v2341_v34, %v2339_v29 }
 0x313   : > { %3700 = vmatprep.subr.bf16.mxu0 %v5644_v43  ;;  %v2577_v43 = vld [vmem:[%s5429_s23 + $0x80] sm:$0xff] }
 0x314   : > { %3866 = vmatpush1.bf16.msra.mxu1 %v5145_v63 }
 0x315   : > { %3868 = vmatprep.subr.bf16.mxu1 %v5148_v28 }
 0x316   : > { %3702 = vmatpush1.bf16.msra.mxu0 %v5645_v46  ;;  %v2578_v46 = vld [vmem:[%s5429_s23 + $0x88] sm:$0xff] }
 0x317   : > { %3704 = vmatprep.subr.bf16.mxu0 %v5646_v52  ;;  %v2561_v52 = vld [vmem:[%s5429_s23] sm:$0xff]  ;;  %v3947_v57 = vpack.c.bf16 %v2578_v46, %v2577_v43  ;;  %v2348_v43 = vld [vmem:[%s5379_s28 + $0x50] sm:$0xff]  ;;  %v2351_v46 = vld [vmem:[%s5379_s28 + $0x68] sm:$0xff] }
 0x318   : > { %3870 = vmatpush1.bf16.msra.mxu1 %v5157_v45 }
 0x319   : > { %3872 = vmatprep.subr.bf16.mxu1 %v5160_v39 }
 0x31a   : > { %3706 = vmatpush1.bf16.msra.mxu0 %v5095_v62  ;;  %v3891_v62 = vpack.c.bf16 %v3059_v31, %v3057_v49  ;;  %v2584_v49 = vld [vmem:[%s5429_s23 + $0xb8] sm:$0xff] }
 0x31b   : > { %3708 = vmatprep.subr.bf16.mxu0 %v5098_v6  ;;  %v3061_v6 = vld [vmem:[%s5379_s28 + $0x168] sm:$0xff] }
 0x31c   : > { %3874 = vmatpush1.bf16.msra.mxu1 %v5169_v13 }
 0x31d   : > { %3876 = vmatprep.subr.bf16.mxu1 %v5172_v23 }
 0x31e   : > { %3710 = vmatpush1.bf16.msra.mxu0 %v5107_v26  ;;  %v3063_v26 = vld [vmem:[%s5379_s28 + $0x178] sm:$0xff] }
 0x31f   : > { %3712 = vmatprep.subr.bf16.mxu0 %v5110_v56 }
 0x320   : > { %3878 = vmatpush1.bf16.msra.mxu1 %v5181_v0 }
 0x321   : > { %3880 = vmatprep.subr.bf16.mxu1 %v5184_v44 }
 0x322   : > { %3714 = vmatpush1.bf16.msra.mxu0 %v5119_v54  ;;  %v3889_v54 = vpack.c.bf16 %v3054_v18, %v3052_v33  ;;  %v2566_v33 = vld [vmem:[%s5429_s23 + $0x28] sm:$0xff]  ;;  %v2583_v18 = vld [vmem:[%s5429_s23 + $0xb0] sm:$0xff] }
 0x323   : > { %3716 = vmatprep.subr.bf16.mxu0 %v5122_v50  ;;  %v3895_v50 = vpack.c.bf16 %v3063_v26, %v3061_v6  ;;  %v3959_v31 = vpack.c.bf16 %v2584_v49, %v2583_v18  ;;  %v2586_v6 = vld [vmem:[%s5429_s23 + $0xc8] sm:$0xff]  ;;  %v2360_v18 = vld [vmem:[%s5379_s28 + $0xb0] sm:$0xff] }
 0x324   : > { %3882 = vmatpush1.bf16.msra.mxu1 %v5191_v35  ;;  %v2363_v49 = vld [vmem:[%s5379_s28 + $0xc8] sm:$0xff] }
 0x325   : > { %3948 = vmatprep.subr.bf16.mxu1 %v3947_v57 }
 0x326   : > { %3718 = vmatpush1.bf16.msra.mxu0 %v5131_v12  ;;  %v3060_v12 = vld [vmem:[%s5379_s28 + $0x160] sm:$0xff] }
 0x327   : > { %2316 = vmatmul.mubr.f32.vlgmr.msra.gmra.mrb[12].mxu1 %v2246_v61  ;;  %3720 = vmatprep.subr.bf16.mxu0 %v5134_v25  ;;  %v3062_v25 = vld [vmem:[%s5379_s28 + $0x170] sm:$0xff]  ;;  %v2562_v61 = vld [vmem:[%s5429_s23 + $0x8] sm:$0xff] }
 0x328   : > { %v3897_v7 = vpack.c.bf16 %v3062_v25, %v3060_v12  ;;  %v2570_v12 = vld [vmem:[%s5429_s23 + $0x48] sm:$0xff]  ;;  %v2587_v25 = vld [vmem:[%s5429_s23 + $0xd0] sm:$0xff] }
 0x32a   : > { %3722 = vmatpush1.bf16.msra.mxu0 %v5145_v63 }
 0x32b   : > { %3724 = vmatprep.subr.bf16.mxu0 %v5148_v28  ;;  %v3065_v28 = vld [vmem:[%s5379_s28 + $0x188] sm:$0xff] }
 0x32e   : > { %3726 = vmatpush1.bf16.msra.mxu0 %v5157_v45  ;;  %v3067_v45 = vld [vmem:[%s5379_s28 + $0x198] sm:$0xff] }
 0x32f   : > { %3728 = vmatprep.subr.bf16.mxu0 %v5160_v39 }
 0x332   : > { %3730 = vmatpush1.bf16.msra.mxu0 %v5169_v13 }
 0x333   : > { %3732 = vmatprep.subr.bf16.mxu0 %v5172_v23 }
 0x336   : > { %3734 = vmatpush1.bf16.msra.mxu0 %v5181_v0  ;;  %v3058_v0 = vld [vmem:[%s5379_s28 + $0x150] sm:$0xff] }
 0x337   : > { %3736 = vmatprep.subr.bf16.mxu0 %v5184_v44  ;;  %v3893_v56 = vpack.c.bf16 %v3058_v0, %v3056_v16  ;;  %v3899_v44 = vpack.c.bf16 %v3067_v45, %v3065_v28  ;;  %v2567_v16 = vld [vmem:[%s5429_s23 + $0x30] sm:$0xff]  ;;  %v2568_v0 = vld [vmem:[%s5429_s23 + $0x38] sm:$0xff] }
 0x338   : > { %v3961_v26 = vpack.c.bf16 %v2568_v0, %v2567_v16  ;;  %v2362_v0 = vld [vmem:[%s5379_s28 + $0xc0] sm:$0xff] }
 0x33a   : > { %3738 = vmatpush1.bf16.msra.mxu0 %v5191_v35  ;;  %v3066_v35 = vld [vmem:[%s5379_s28 + $0x190] sm:$0xff] }
 0x33b   : > { %3884 = vmatprep.subr.bf16.mxu0 %v3883_v10  ;;  %v3901_v53 = vpack.c.bf16 %v3066_v35, %v3064_v30  ;;  %v3949_v10 = vpack.c.bf16 %v2562_v61, %v2561_v52  ;;  %v2353_v52 = vld [vmem:[%s5379_s28 + $0x78] sm:$0xff] }
 0x33c   : > { %v3927_v61 = vpack.c.bf16 %v2353_v52, %v2351_v46 }
 0x33d   : > { %2092 = vmatmul.mubr.f32.vlgmr.msra.gmra.mrb[8].mxu0 %v2022_v41  ;;  %v3068_v41 = vld [vmem:[%s5379_s28 + $0x1a0] sm:$0xff]  ;;  %3950 = vmatpush3.bf16.msra.mxu1 %v3949_v10  ;;  %v2355_v10 = vld [vmem:[%s5379_s28 + $0x88] sm:$0xff] }
 0x33e   : > { %2467 = vmatprep.mubr.f32.mxu0 %v5647_v14  ;;  %3886 = vmatpush1.bf16.msra.mxu0 %v3885_v40  ;;  %v3905_v47 = vpack.c.bf16 %v3070_v42, %v3068_v41  ;;  %v2582_v40 = vld [vmem:[%s5429_s23 + $0xa8] sm:$0xff] }
 0x33f   : > { %3888 = vmatprep.subr.bf16.mxu0 %v3887_v5  ;;  %v3955_v9 = vpack.c.bf16 %v2582_v40, %v2581_v36  ;;  %v2565_v5 = vld [vmem:[%s5429_s23 + $0x20] sm:$0xff]  ;;  %v2356_v36 = vld [vmem:[%s5379_s28 + $0x90] sm:$0xff]  ;;  %v2359_v40 = vld [vmem:[%s5379_s28 + $0xa8] sm:$0xff] }
 0x342   : > { %3890 = vmatpush1.bf16.msra.mxu0 %v3889_v54  ;;  %v3957_v54 = vpack.c.bf16 %v2566_v33, %v2565_v5  ;;  %v2358_v33 = vld [vmem:[%s5379_s28 + $0xa0] sm:$0xff] }
 0x343   : > { %3892 = vmatprep.subr.bf16.mxu0 %v3891_v62  ;;  %v2585_v62 = vld [vmem:[%s5429_s23 + $0xc0] sm:$0xff] }
 0x346   : > { %3894 = vmatpush1.bf16.msra.mxu0 %v3893_v56  ;;  %v3963_v56 = vpack.c.bf16 %v2586_v6, %v2585_v62  ;;  %v2364_v62 = vld [vmem:[%s5379_s28 + $0xd0] sm:$0xff]  ;;  %v2367_v6 = vld [vmem:[%s5379_s28 + $0xe8] sm:$0xff] }
 0x347   : > { %3896 = vmatprep.subr.bf16.mxu0 %v3895_v50  ;;  %v2569_v50 = vld [vmem:[%s5429_s23 + $0x40] sm:$0xff] }
 0x348   : > { %v3965_v28 = vpack.c.bf16 %v2570_v12, %v2569_v50  ;;  %v2366_v12 = vld [vmem:[%s5379_s28 + $0xe0] sm:$0xff] }
 0x34a   : > { %3898 = vmatpush1.bf16.msra.mxu0 %v3897_v7  ;;  %v2590_v7 = vld [vmem:[%s5429_s23 + $0xe8] sm:$0xff] }
 0x34b   : > { %3900 = vmatprep.subr.bf16.mxu0 %v3899_v44 }
 0x34e   : > { %3902 = vmatpush1.bf16.msra.mxu0 %v3901_v53 }
 0x34f   : > { %3904 = vmatprep.subr.bf16.mxu0 %v3903_v37 }
 0x352   : > { %3906 = vmatpush1.bf16.msra.mxu0 %v3905_v47  ;;  %v2338_v47 = vld [vmem:[%s5379_s28] sm:$0xff] }
 0x353   : > { %3908 = vmatprep.subr.bf16.mxu0 %v3907_v55  ;;  %v2343_v55 = vld [vmem:[%s5379_s28 + $0x28] sm:$0xff] }
 0x354   : > { %v3919_v8 = vpack.c.bf16 %v2345_v59, %v2343_v55 }
 0x356   : > { %3910 = vmatpush1.bf16.msra.mxu0 %v3909_v2  ;;  %v3917_v2 = vpack.c.bf16 %v2340_v48, %v2338_v47 }
 0x357   : > { %3912 = vmatprep.subr.bf16.mxu0 %v3911_v11  ;;  %v2342_v11 = vld [vmem:[%s5379_s28 + $0x20] sm:$0xff] }
 0x358   : > { %v3921_v29 = vpack.c.bf16 %v2344_v20, %v2342_v11 }
 0x35a   : > { %3914 = vmatpush1.bf16.msra.mxu0 %v3913_v24  ;;  %v2349_v24 = vld [vmem:[%s5379_s28 + $0x58] sm:$0xff] }
 0x35b   : > { %3916 = vmatprep.subr.bf16.mxu0 %v3915_v38  ;;  %v3923_v34 = vpack.c.bf16 %v2349_v24, %v2347_v21  ;;  %v2346_v38 = vld [vmem:[%s5379_s28 + $0x40] sm:$0xff] }
 0x35c   : > { %v3925_v57 = vpack.c.bf16 %v2348_v43, %v2346_v38 }
 0x36a   : > { %v1867_v4 = vpop.f32.mrb[10].mxu1 }
 0x36b   : > { %v1869_v17 = vpop.f32.mrb[11].mxu1 }
 0x380   : > { %v1643_v63 = vpop.f32.mrb[6].mxu0 }
 0x381   : > { %v1874_v39 = vmax.f32 %v1643_v63, %v1867_v4  ;;  %v1645_v13 = vpop.f32.mrb[7].mxu0  ;;  %v3951_v4 = vpack.c.bf16 %v2580_v1, %v2579_v15  ;;  %v2588_v63 = vld [vmem:[%s5429_s23 + $0xd8] sm:$0xff]  ;;  %v2350_v15 = vld [vmem:[%s5379_s28 + $0x60] sm:$0xff]  ;;  %v2352_v1 = vld [vmem:[%s5379_s28 + $0x70] sm:$0xff] }
 0x382   : > { %v1875_v23 = vmax.f32 %v1645_v13, %v1869_v17  ;;  %v2563_v17 = vld [vmem:[%s5429_s23 + $0x10] sm:$0xff]  ;;  %v3967_v45 = vpack.c.bf16 %v2588_v63, %v2587_v25  ;;  %v2572_v13 = vld [vmem:[%s5429_s23 + $0x58] sm:$0xff] }
 0x383   : > { %v3953_v19 = vpack.c.bf16 %v2564_v22, %v2563_v17  ;;  %3952 = vmatprep.subr.bf16.mxu1 %v3951_v4  ;;  %v3929_v4 = vpack.c.bf16 %v2352_v1, %v2350_v15  ;;  %v2354_v22 = vld [vmem:[%s5379_s28 + $0x80] sm:$0xff]  ;;  %v2368_v25 = vld [vmem:[%s5379_s28 + $0xf0] sm:$0xff] }
 0x384   : > { %v5409_v58 = vmax.f32 %v1874_v39, %v1875_v23  ;;  %v2571_v39 = vld [vmem:[%s5429_s23 + $0x50] sm:$0xff]  ;;  %v2589_v23 = vld [vmem:[%s5429_s23 + $0xe0] sm:$0xff]  ;;  %v3945_v63 = vpack.c.bf16 %v2368_v25, %v2366_v12 }
 0x385   : > { %3954 = vmatpush3.bf16.msra.mxu1 %v3953_v19  ;;  %v3969_v44 = vpack.c.bf16 %v2572_v13, %v2571_v39  ;;  %v3971_v30 = vpack.c.bf16 %v2590_v7, %v2589_v23  ;;  %v2361_v19 = vld [vmem:[%s5379_s28 + $0xb8] sm:$0xff]  ;;  %v2573_v39 = vld [vmem:[%s5429_s23 + $0x60] sm:$0xff]  ;;  %v2574_v13 = vld [vmem:[%s5429_s23 + $0x68] sm:$0xff] }
 0x386   : > { %3956 = vmatprep.subr.bf16.mxu1 %v3955_v9  ;;  %v3933_v9 = vpack.c.bf16 %v2356_v36, %v2354_v22  ;;  %v3935_v5 = vpack.c.bf16 %v2361_v19, %v2359_v40  ;;  %v3973_v23 = vpack.c.bf16 %v2574_v13, %v2573_v39  ;;  %v2591_v7 = vld [vmem:[%s5429_s23 + $0xf0] sm:$0xff] }
 0x389   : > { %3958 = vmatpush3.bf16.msra.mxu1 %v3957_v54  ;;  %v2365_v54 = vld [vmem:[%s5379_s28 + $0xd8] sm:$0xff] }
 0x38a   : > { %3960 = vmatprep.subr.bf16.mxu1 %v3959_v31  ;;  %v3937_v31 = vpack.c.bf16 %v2360_v18, %v2358_v33  ;;  %v3939_v16 = vpack.c.bf16 %v2365_v54, %v2363_v49 }
 0x38d   : > { %3962 = vmatpush3.bf16.msra.mxu1 %v3961_v26  ;;  %v2369_v26 = vld [vmem:[%s5379_s28 + $0xf8] sm:$0xff] }
 0x38e   : > { %3964 = vmatprep.subr.bf16.mxu1 %v3963_v56  ;;  %v3941_v56 = vpack.c.bf16 %v2364_v62, %v2362_v0  ;;  %v3943_v50 = vpack.c.bf16 %v2369_v26, %v2367_v6 }
 0x391   : > { %3966 = vmatpush3.bf16.msra.mxu1 %v3965_v28  ;;  %v2333_v28 = vadd.f32 %v3047_v51, %v5409_v58  ;;  %v2545_v58 = vld [vmem:[%s4603_s16] sm:$0x3] }
 0x392   : > { %3968 = vmatprep.subr.bf16.mxu1 %v3967_v45 }
 0x393   : > { %v2334_v45 = vmax.f32 %v2333_v28, 0.0 }
 0x395   : > { %3970 = vmatpush3.bf16.msra.mxu1 %v3969_v44  ;;  %v2592_v44 = vld [vmem:[%s5429_s23 + $0xf8] sm:$0xff] }
 0x396   : > { %3972 = vmatprep.subr.bf16.mxu1 %v3971_v30  ;;  %v3975_v30 = vpack.c.bf16 %v2592_v44, %v2591_v7 }
 0x399   : > { %3974 = vmatpush3.bf16.msra.mxu1 %v3973_v23 }
 0x39a   : > { %3976 = vmatprep.subr.bf16.mxu1 %v3975_v30 }
 0x3fa   : > { %v2317_v35 = vpop.f32.mrb[12].mxu1 }
 0x3fb   : > { %v2319_v32 = vpop.f32.mrb[13].mxu1 }
 0x410   : > { %v2093_v27 = vpop.f32.mrb[8].mxu0 }
 0x411   : > { %v2324_v53 = vmax.f32 %v2093_v27, %v2317_v35  ;;  %v2095_v37 = vpop.f32.mrb[9].mxu0  ;;  %v2575_v35 = vld [vmem:[%s5429_s23 + $0x70] sm:$0xff] }
 0x412   : > { %v2325_v41 = vmax.f32 %v2095_v37, %v2319_v32  ;;  %v2576_v32 = vld [vmem:[%s5429_s23 + $0x78] sm:$0xff] }
 0x413   : > { %v3977_v27 = vpack.c.bf16 %v2576_v32, %v2575_v35 }
 0x414   : > { %v2335_v42 = vmax.f32 %v2324_v53, %v2325_v41  ;;  %v5648_v53 = vld [vmem:[#allocation18_spill] sm:$0xff] }
 0x415   : > { %3978 = vmatpush3.bf16.msra.mxu1 %v3977_v27  ;;  %v5649_v37 = vsub.s32 0, %v5648_v53 }
 0x416   : > { %v2336_v60 = vadd.f32 %v3047_v51, %v2335_v42  ;;  %v5650_v42 = vsub.s32 1, %v5648_v53 }
 0x417   : > { %v2550_v41 = vrot.slane %v2545_v58, %v5649_v37 }
 0x418   : > { %v2337_v3 = vmax.f32 %v2336_v60, 0.0  ;;  %v2554_v47 = vrot.slane %v2545_v58, %v5650_v42 }
 0x41a   : > { %2468 = vmatmul.mubr.f32.vlgmr.msra.gmra.mrb[10].mxu0 %v2337_v3 }
 0x41b   : > { %3918 = vmatpush1.bf16.msra.mxu0 %v3917_v2  ;;  %2538 = vmatprep.mubr.f32.mxu0 %v5647_v14  ;;  %v2357_v14 = vld [vmem:[%s5379_s28 + $0x98] sm:$0xff] }
 0x41c   : > { %3920 = vmatprep.subr.bf16.mxu0 %v3919_v8  ;;  %v3931_v17 = vpack.c.bf16 %v2357_v14, %v2355_v10  ;;  %v3080_v8 = vld [vmem:[%s493_s11] ss:$0 sm:$0xff] }
 0x41f   : > { %3922 = vmatpush1.bf16.msra.mxu0 %v3921_v29 }
 0x420   : > { %3924 = vmatprep.subr.bf16.mxu0 %v3923_v34 }
 0x423   : > { %3926 = vmatpush1.bf16.msra.mxu0 %v3925_v57 }
 0x424   : > { %3928 = vmatprep.subr.bf16.mxu0 %v3927_v61 }
 0x427   : > { %3930 = vmatpush1.bf16.msra.mxu0 %v3929_v4 }
 0x428   : > { %3932 = vmatprep.subr.bf16.mxu0 %v3931_v17 }
 0x42b   : > { %3934 = vmatpush1.bf16.msra.mxu0 %v3933_v9 }
 0x42c   : > { %3936 = vmatprep.subr.bf16.mxu0 %v3935_v5 }
 0x42f   : > { %3938 = vmatpush1.bf16.msra.mxu0 %v3937_v31 }
 0x430   : > { %3940 = vmatprep.subr.bf16.mxu0 %v3939_v16 }
 0x433   : > { %3942 = vmatpush1.bf16.msra.mxu0 %v3941_v56 }
 0x434   : > { %3944 = vmatprep.subr.bf16.mxu0 %v3943_v50 }
 0x437   : > { %3946 = vmatpush1.bf16.msra.mxu0 %v3945_v63 }
 0x43a   : > { %2539 = vmatmul.mubr.f32.vlgmr.msra.gmra.mrb[10].mxu0 %v2334_v45 }
 0x50d   : > { %v2540_v48 = vpop.f32.mrb[10].mxu0 }
 0x50e   : > { %v2557_v51 = vadd.f32 %v2550_v41, %v2540_v48  ;;  %v2542_v55 = vpop.f32.mrb[11].mxu0 }
 0x50f   : > { %v2558_v59 = vadd.f32 %v2554_v47, %v2542_v55 }
 0x510   : > { %v2559_v2 = vmax.f32 %v2557_v51, 0.0 }
 0x511   : > { %v2560_v60 = vmax.f32 %v2558_v59, 0.0 }
 0x513   : > { %2664 = vmatprep.mubr.f32.mxu1 %v2560_v60 }
 0x514   : > { %2665 = vmatmul.mubr.f32.vlgmr.msra.gmra.mrb[14].mxu1 %v2559_v2 }
 0x5e7   : > { %v3148_v3 = vpop.f32.mrb[14].mxu1 }
 0x5e8   : > { %v3149_v11 = vpop.f32.mrb[15].mxu1 }
 0x5e9   : > { %v3150_v20 = vadd.f32 %v3149_v11, %v3148_v3 }
 0x5eb   : > { %v2667_v21 = vadd.f32 %v3150_v20, %v3080_v8 }
 0x5ed   : > { %v2670_v24 = vmax.f32 %v2667_v21, 0.0 }
 0x5ef   : > { %2671 = vst [vmem:[%s602_s18] sm:$0x3] %v2670_v24 }
 0x5f0 PF: > { %s28_s14 = sadd.s32 1, %s4291_s14   ;;  %s5651_s19 = sld [smem:[#allocation15_spill]] }
 0x5f1   : > { %p25_p9 = scmp.ge.s32.totalorder %s28_s14, 4   ;;  %s5652_s11 = sld [smem:[#allocation17_spill]] }
 0x5f2   : > { %s5653_s24 = sld [smem:[#allocation16_spill]]  ;;  %s5654_s30 = smov %s4275_s10 }
 0x5f3   : > { %s5656_s12 = smov %s4287_s13  ;;  %27 = sbr.rel (!%p25_p9) target bundleno = 11 (0xb), region = 162 }
 0x5f6   : > { %s5655_s10 = smov %s5651_s19 }
 0x5f8   : > { %s5657_s13 = smov %s5653_s24 }
 0x5fa   :  { %2697 = vsyncpa [#allocation5], 1 }
 0x5fb   :  { %2699 = vsyncpa [#allocation5 + $0x1], 1 }
 0x5fc   :  { %2700 = vsyncpa [#allocation7], 1 }
 0x5fd   :  { %2702 = vsyncpa [#allocation7 + $0x1], 1 }
 0x5fe   :  { %2703 = vsyncpa [#allocation10], 1 }
 0x5ff   :  { %2705 = vsyncpa [#allocation10 + $0x1], 1 }

</bundles_post_ra>
